<compile_context>
chip_gen: v6e
topology: v6e:2x2x1
jax: 0.10.0
libtpu: 0.0.40
codegen_flags: <defaults>
</compile_context>

<pallas_src>
from functools import lru_cache, partial

import numpy as np
import jax
import jax.numpy as jnp
from jax.experimental import pallas as pl
from jax.experimental.pallas import tpu as pltpu


def bilinear_matrix(src, dst):
    """cv2-style (half-pixel) bilinear interpolation matrix of shape (dst, src)."""
    scale = src / dst
    pos = (np.arange(dst, dtype=np.float64) + 0.5) * scale - 0.5
    pos = np.clip(pos, 0.0, src - 1)
    lo = np.floor(pos).astype(np.int64)
    hi = np.minimum(lo + 1, src - 1)
    frac = (pos - lo).astype(np.float32)
    m = np.zeros((dst, src), dtype=np.float32)
    m[np.arange(dst), lo] += 1.0 - frac
    m[np.arange(dst), hi] += frac
    return m


@lru_cache(maxsize=None)
def _resize_constants(h, w, out_size):
    """Device-resident interpolation constants, cached across calls."""
    rowm = bilinear_matrix(h, out_size)                               # (OUT, H)
    colm_t = bilinear_matrix(w, out_size).T.astype(np.float32)        # (W, OUT)
    ctile = np.tile(colm_t, (h, 1))                                   # (HW, OUT)
    imat = np.kron(np.eye(h, dtype=np.float32),
                   np.ones((1, w), np.float32))                       # (H, HW)
    return jnp.asarray(rowm), jnp.asarray(ctile), jnp.asarray(imat)


# ---------------------------------------------------------------------------
# Fused kernel: features -> logits -> predicted-class CAM -> normalize -> resize
# ---------------------------------------------------------------------------
def cam_resize_kernel(x_ref, cw_ref, cb_ref, clw_ref, clb_ref,
                      imat_ref, ctile_ref, rowm_ref, out_ref, lhs_ref):
    # x_ref:    (BT, Cin, HW)   channel-major input (lane dim = HW)
    # cw_ref:   (Cfeat, Cin)    1x1-conv weight
    # cb_ref:   (Cfeat, 1)      conv bias
    # clw_ref:  (NC, Cfeat)     classifier weight
    # clb_ref:  (NC, 1)         classifier bias
    # imat_ref: (H, HW)         row-block indicator: imat[h, h*W:(h+1)*W] = 1
    # ctile_ref:(HW, OUT)       column interp matrix tiled H times (row h*W+w = colm[w,:])
    # rowm_ref: (OUT, H)        row interp matrix
    # out_ref:  (BT, OUT, OUT)
    # lhs_ref:  (BT*H, HW)      VMEM scratch holding the stacked (imat * cam) blocks
    bt = out_ref.shape[0]
    h, hw = imat_ref.shape
    nc = clw_ref.shape[0]

    cw = cw_ref[...]
    cb = cb_ref[...]
    clw = clw_ref[...]
    clb = clb_ref[...]
    imat = imat_ref[...]
    iota = jax.lax.broadcasted_iota(jnp.int32, (nc, 1), 0)

    # Static unroll: per-iteration temporaries are now only ~(NC,HW) + (H,HW)
    # (the (HW,OUT) broadcast multiply of the previous version is gone).
    for b in range(bt):
        xb = x_ref[b]                                                        # (Cin, HW)
        feat = jnp.dot(cw, xb, preferred_element_type=jnp.float32) + cb      # (Cfeat, HW)
        feat = jnp.maximum(feat, 0.0)
        cam_all = jnp.dot(clw, feat, preferred_element_type=jnp.float32)     # (NC, HW)
        # logits = classifier(GAP(feat)); GAP commutes with the linear layer.
        logits = jnp.mean(cam_all, axis=1, keepdims=True) + clb              # (NC, 1)
        # first-index argmax (matches torch.max tie-break)
        maxv = jnp.max(logits)
        pred = jnp.min(jnp.where(logits >= maxv, iota, nc))
        mask = (iota == pred).astype(jnp.float32)                            # (NC, 1)
        cam = jnp.sum(cam_all * mask, axis=0, keepdims=True)                 # (1, HW)
        cam = jnp.maximum(cam, 0.0)
        mn = jnp.min(cam)
        mx = jnp.max(cam)
        cam = (cam - mn) * (1.0 / (mx - mn + 1e-8))     # scalar recip + VPU multiply
        # Fold the normalized CAM into the matmul LHS (no (HW,OUT) broadcast mult).
        lhs_ref[b * h:(b + 1) * h, :] = imat * cam                           # (H, HW)

    # Batched column pass: ONE MXU matmul for the whole batch tile;
    # ctile is pushed through the MXU once per grid step.
    tmp = jnp.dot(lhs_ref[...], ctile_ref[...],
                  preferred_element_type=jnp.float32)                        # (BT*H, OUT)
    rowm = rowm_ref[...]
    for b in range(bt):                      # row pass already has M = OUT = 256
        out_ref[b] = jnp.dot(rowm, tmp[b * h:(b + 1) * h, :],
                             preferred_element_type=jnp.float32)             # (OUT, OUT)


# ---------------------------------------------------------------------------
# Generation-aware batch-tile selection
# ---------------------------------------------------------------------------
def _tensorcores_per_device():
    """2 on v7x (the 'parallel' grid axis feeds both TCs), 1 on v5e/v6e."""
    try:
        d = jax.devices()[0]
        kind = (getattr(d, "device_kind", "") or "").lower()
        if "v7" in kind:
            return 2
        n = getattr(d, "num_cores", None)
        return max(1, int(n)) if isinstance(n, int) else 1
    except Exception:
        return 1


def _pick_batch_tile(batch, num_cores, out_size):
    # The output block is double-buffered at out_size^2*4 bytes per image per
    # buffer (256 KiB at OUT=256).  Cap the tile so the pipeline stays well
    # inside the default scoped-VMEM limit on every generation (incl. v7x's
    # smaller 64 MiB physical VMEM), leaving room for constants + scratch.
    max_tile = max(1, int((12 << 20) // (2 * out_size * out_size * 4)))
    max_tile = min(max_tile, 16)
    if num_cores <= 1:
        # Single TensorCore (v5e/v6e): extra grid steps buy no parallelism,
        # only per-step pipeline overhead -> one grid step when the batch fits.
        tile = min(batch, max_tile)
        while batch % tile:
            tile -= 1
        return tile
    # v7x megacore: keep >= num_cores grid steps so both TCs get work, with the
    # largest divisor tile that still allows it.
    tile = 1
    for d in range(1, min(max_tile, batch) + 1):
        if batch % d == 0 and (batch // d) >= num_cores:
            tile = d
    return tile


# ---------------------------------------------------------------------------
# Host-side wrapper
# ---------------------------------------------------------------------------
@partial(jax.jit, static_argnames=("out_size", "b_tile"))
def basic_cam_forward(x, conv_w, conv_b, cls_w, cls_b, out_size=256, b_tile=None):
    """x: (B, Cin, H, W) float32 -> batch_cams: (B, out_size, out_size) float32."""
    B, Cin, H, W = x.shape
    HW = H * W
    Cfeat = conv_w.shape[0]
    NC = cls_w.shape[0]
    if b_tile is None:
        b_tile = _pick_batch_tile(B, _tensorcores_per_device(), out_size)
    assert B % b_tile == 0
    grid = (B // b_tile,)

    # Channel-major: a plain reshape of the NCHW input (no transpose/HBM pass).
    x3 = x.reshape(B, Cin, HW)
    cb = conv_b.reshape(Cfeat, 1)
    clb = cls_b.reshape(NC, 1)
    rowm, ctile, imat = _resize_constants(H, W, out_size)

    return pl.pallas_call(
        cam_resize_kernel,
        out_shape=jax.ShapeDtypeStruct((B, out_size, out_size), jnp.float32),
        grid_spec=pltpu.PrefetchScalarGridSpec(
            num_scalar_prefetch=0,
            grid=grid,
            in_specs=[
                pl.BlockSpec((b_tile, Cin, HW), lambda b: (b, 0, 0)),
                pl.BlockSpec((Cfeat, Cin), lambda b: (0, 0)),
                pl.BlockSpec((Cfeat, 1), lambda b: (0, 0)),
                pl.BlockSpec((NC, Cfeat), lambda b: (0, 0)),
                pl.BlockSpec((NC, 1), lambda b: (0, 0)),
                pl.BlockSpec((H, HW), lambda b: (0, 0)),
                pl.BlockSpec((HW, out_size), lambda b: (0, 0)),
                pl.BlockSpec((out_size, H), lambda b: (0, 0)),
            ],
            out_specs=pl.BlockSpec((b_tile, out_size, out_size),
                                   lambda b: (b, 0, 0)),
            scratch_shapes=[pltpu.VMEM((b_tile * H, HW), jnp.float32)],
        ),
        compiler_params=pltpu.CompilerParams(dimension_semantics=("parallel",)),
    )(x3, conv_w, cb, cls_w, clb, imat, ctile, rowm)


# ---------------------------------------------------------------------------
# Pure-JAX reference (for correctness check)
# ---------------------------------------------------------------------------
def reference(x, conv_w, conv_b, cls_w, cls_b, out_size=256):
    B, Cin, H, W = x.shape
    xf = x.reshape(B, Cin, H * W)
    feat = jnp.maximum(jnp.einsum("fc,bcs->bfs", conv_w, xf) + conv_b[None], 0.0)
    gap = feat.mean(axis=2)                                    # (B, Cfeat)
    logits = gap @ cls_w.T + cls_b[:, 0][None]
    pred = jnp.argmax(logits, axis=1)
    w = cls_w[pred]                                            # (B, Cfeat)
    cam = jnp.einsum("bf,bfs->bs", w, feat).reshape(B, H, W)
    cam = jnp.maximum(cam, 0.0)
    cam = cam - cam.min(axis=(1, 2), keepdims=True)
    cam = cam / (cam.max(axis=(1, 2), keepdims=True) + 1e-8)
    rowm = jnp.asarray(bilinear_matrix(H, out_size))
    colm = jnp.asarray(bilinear_matrix(W, out_size)).T
    return jnp.einsum("oh,bhw,wp->bop", rowm, cam, colm)


if __name__ == "__main__":
    B, Cin, H, W = 2, 4, 16, 16
    Cfeat, NC = 32, 10

    key = jax.random.PRNGKey(0)
    kx, kcw, kcb, klw, klb = jax.random.split(key, 5)
    x = jax.random.normal(kx, (B, Cin, H, W), dtype=jnp.float32)
    conv_w = 0.1 * jax.random.normal(kcw, (Cfeat, Cin), dtype=jnp.float32)
    conv_b = 0.1 * jax.random.normal(kcb, (Cfeat, 1), dtype=jnp.float32)
    cls_w = 0.1 * jax.random.normal(klw, (NC, Cfeat), dtype=jnp.float32)
    cls_b = 0.1 * jax.random.normal(klb, (NC, 1), dtype=jnp.float32)

    out = jax.block_until_ready(
        basic_cam_forward(x, conv_w, conv_b, cls_w, cls_b, out_size=256)
    )
    ref = jax.block_until_ready(reference(x, conv_w, conv_b, cls_w, cls_b, 256))

    assert out.shape == (B, 256, 256) and out.dtype == jnp.float32
    # tolerance slightly relaxed vs 1e-5: logits/CAM sums are reassociated
    # (GAP commuted through the linear layer), giving ~1e-6 fp32 differences.
    np.testing.assert_allclose(np.asarray(out), np.asarray(ref), rtol=2e-5, atol=2e-5)
    print("KERNEL_OK")

    # TODO(synk): _generate_cam_image / visualize_batch (cv2 colormap + matplotlib
    # overlay) are host-side visualization, not part of the tensor forward path.
</pallas_src>

<mosaic_0001>
module attributes {stable_mosaic.version = 11 : i64} {
  func.func @cam_resize_kernel(%arg0: i32, %arg1: memref<2x4x256xf32, #tpu.memory_space<vmem>>, %arg2: memref<32x4xf32, #tpu.memory_space<vmem>>, %arg3: memref<32x1xf32, #tpu.memory_space<vmem>>, %arg4: memref<10x32xf32, #tpu.memory_space<vmem>>, %arg5: memref<10x1xf32, #tpu.memory_space<vmem>>, %arg6: memref<16x256xf32, #tpu.memory_space<vmem>>, %arg7: memref<256x256xf32, #tpu.memory_space<vmem>>, %arg8: memref<256x16xf32, #tpu.memory_space<vmem>>, %arg9: memref<2x256x256xf32, #tpu.memory_space<vmem>>, %arg10: memref<32x256xf32, #tpu.memory_space<vmem>>) attributes {dimension_semantics = [#tpu.dimension_semantics<parallel>], iteration_bounds = array<i64: 1>, scalar_prefetch = 0 : i64, scratch_operands = 1 : i64, tpu.core_type = #tpu.core_type<tc>, window_params = [{transform_indices = @transform_0, window_bounds = array<i64: 2, 4, 256>}, {pipeline_mode = #tpu.pipeline_mode<synchronous>, transform_indices = @transform_1, window_bounds = array<i64: 32, 4>}, {pipeline_mode = #tpu.pipeline_mode<synchronous>, transform_indices = @transform_2, window_bounds = array<i64: 32, 1>}, {pipeline_mode = #tpu.pipeline_mode<synchronous>, transform_indices = @transform_3, window_bounds = array<i64: 10, 32>}, {pipeline_mode = #tpu.pipeline_mode<synchronous>, transform_indices = @transform_4, window_bounds = array<i64: 10, 1>}, {pipeline_mode = #tpu.pipeline_mode<synchronous>, transform_indices = @transform_5, window_bounds = array<i64: 16, 256>}, {pipeline_mode = #tpu.pipeline_mode<synchronous>, transform_indices = @transform_6, window_bounds = array<i64: 256, 256>}, {pipeline_mode = #tpu.pipeline_mode<synchronous>, transform_indices = @transform_7, window_bounds = array<i64: 256, 16>}, {transform_indices = @transform_8, window_bounds = array<i64: 2, 256, 256>}]} {
    %c0 = arith.constant 0 : index
    %c0_0 = arith.constant 0 : index
    %0 = vector.load %arg2[%c0, %c0_0] : memref<32x4xf32, #tpu.memory_space<vmem>>, vector<32x4xf32>
    %c0_1 = arith.constant 0 : index
    %c0_2 = arith.constant 0 : index
    %1 = vector.load %arg3[%c0_1, %c0_2] : memref<32x1xf32, #tpu.memory_space<vmem>>, vector<32x1xf32>
    %c0_3 = arith.constant 0 : index
    %c0_4 = arith.constant 0 : index
    %2 = vector.load %arg4[%c0_3, %c0_4] : memref<10x32xf32, #tpu.memory_space<vmem>>, vector<10x32xf32>
    %c0_5 = arith.constant 0 : index
    %c0_6 = arith.constant 0 : index
    %3 = vector.load %arg5[%c0_5, %c0_6] : memref<10x1xf32, #tpu.memory_space<vmem>>, vector<10x1xf32>
    %c0_7 = arith.constant 0 : index
    %c0_8 = arith.constant 0 : index
    %4 = vector.load %arg6[%c0_7, %c0_8] : memref<16x256xf32, #tpu.memory_space<vmem>>, vector<16x256xf32>
    %5 = tpu.iota {dimensions = array<i32: 0>} : vector<10x1xi32>
    %c0_9 = arith.constant 0 : index
    %c0_10 = arith.constant 0 : index
    %c0_11 = arith.constant 0 : index
    %6 = vector.load %arg1[%c0_9, %c0_10, %c0_11] : memref<2x4x256xf32, #tpu.memory_space<vmem>>, vector<1x4x256xf32>
    %7 = vector.shape_cast %6 : vector<1x4x256xf32> to vector<4x256xf32>
    %cst = arith.constant dense<0.000000e+00> : vector<32x256xf32>
    %8 = tpu.matmul %0, %7, %cst {dimension_numbers = #tpu.dot_dimension_numbers<[1], [0], [0], [1], [0, 0, 1, 1], [], []>} : vector<32x4xf32>, vector<4x256xf32>, vector<32x256xf32> -> vector<32x256xf32>
    %9 = vector.broadcast %1 : vector<32x1xf32> to vector<32x256xf32>
    %10 = arith.addf %8, %9 : vector<32x256xf32>
    %cst_12 = arith.constant 0.000000e+00 : f32
    %11 = vector.broadcast %cst_12 : f32 to vector<32x256xf32>
    %12 = arith.maximumf %10, %11 : vector<32x256xf32>
    %cst_13 = arith.constant dense<0.000000e+00> : vector<10x256xf32>
    %13 = tpu.matmul %2, %12, %cst_13 {dimension_numbers = #tpu.dot_dimension_numbers<[1], [0], [0], [1], [0, 0, 1, 1], [], []>} : vector<10x32xf32>, vector<32x256xf32>, vector<10x256xf32> -> vector<10x256xf32>
    %cst_14 = arith.constant dense<0.000000e+00> : vector<10xf32>
    %14 = vector.multi_reduction <add>, %13, %cst_14 [1] : vector<10x256xf32> to vector<10xf32>
    %15 = vector.shape_cast %14 : vector<10xf32> to vector<10x1xf32>
    %cst_15 = arith.constant 2.560000e+02 : f32
    %16 = vector.broadcast %cst_15 : f32 to vector<10x1xf32>
    %17 = arith.divf %15, %16 : vector<10x1xf32>
    %18 = arith.addf %17, %3 : vector<10x1xf32>
    %19 = vector.shape_cast %18 : vector<10x1xf32> to vector<1x10x1xf32>
    %cst_16 = arith.constant dense<0xFF800000> : vector<1xf32>
    %20 = vector.multi_reduction <maximumf>, %19, %cst_16 [1, 2] : vector<1x10x1xf32> to vector<1xf32>
    %21 = vector.shape_cast %20 : vector<1xf32> to vector<1x1x1xf32>
    %22 = vector.extract %21[0, 0, 0] : f32 from vector<1x1x1xf32>
    %23 = vector.broadcast %22 : f32 to vector<10x1xf32>
    %24 = arith.cmpf oge, %18, %23 : vector<10x1xf32>
    %c10_i32 = arith.constant 10 : i32
    %25 = vector.broadcast %c10_i32 : i32 to vector<10x1xi32>
    %26 = arith.select %24, %5, %25 : vector<10x1xi1>, vector<10x1xi32>
    %27 = vector.shape_cast %26 : vector<10x1xi32> to vector<1x10x1xi32>
    %cst_17 = arith.constant dense<2147483647> : vector<1xi32>
    %28 = vector.multi_reduction <minsi>, %27, %cst_17 [1, 2] : vector<1x10x1xi32> to vector<1xi32>
    %29 = vector.shape_cast %28 : vector<1xi32> to vector<1x1x1xi32>
    %30 = vector.extract %29[0, 0, 0] : i32 from vector<1x1x1xi32>
    %31 = vector.broadcast %30 : i32 to vector<10x1xi32>
    %32 = arith.cmpi eq, %5, %31 : vector<10x1xi32>
    %33 = arith.extui %32 : vector<10x1xi1> to vector<10x1xi32>
    %34 = arith.sitofp %33 : vector<10x1xi32> to vector<10x1xf32>
    %35 = vector.broadcast %34 : vector<10x1xf32> to vector<10x256xf32>
    %36 = arith.mulf %13, %35 : vector<10x256xf32>
    %cst_18 = arith.constant dense<0.000000e+00> : vector<256xf32>
    %37 = vector.multi_reduction <add>, %36, %cst_18 [0] : vector<10x256xf32> to vector<256xf32>
    %38 = vector.shape_cast %37 : vector<256xf32> to vector<1x256xf32>
    %cst_19 = arith.constant 0.000000e+00 : f32
    %39 = vector.broadcast %cst_19 : f32 to vector<1x256xf32>
    %40 = arith.maximumf %38, %39 : vector<1x256xf32>
    %41 = vector.shape_cast %40 : vector<1x256xf32> to vector<1x1x256xf32>
    %cst_20 = arith.constant dense<0x7F800000> : vector<1xf32>
    %42 = vector.multi_reduction <minimumf>, %41, %cst_20 [1, 2] : vector<1x1x256xf32> to vector<1xf32>
    %43 = vector.shape_cast %42 : vector<1xf32> to vector<1x1x1xf32>
    %44 = vector.extract %43[0, 0, 0] : f32 from vector<1x1x1xf32>
    %45 = vector.shape_cast %40 : vector<1x256xf32> to vector<1x1x256xf32>
    %cst_21 = arith.constant dense<0xFF800000> : vector<1xf32>
    %46 = vector.multi_reduction <maximumf>, %45, %cst_21 [1, 2] : vector<1x1x256xf32> to vector<1xf32>
    %47 = vector.shape_cast %46 : vector<1xf32> to vector<1x1x1xf32>
    %48 = vector.extract %47[0, 0, 0] : f32 from vector<1x1x1xf32>
    %49 = vector.broadcast %44 : f32 to vector<1x256xf32>
    %50 = arith.subf %40, %49 : vector<1x256xf32>
    %51 = arith.subf %48, %44 : f32
    %cst_22 = arith.constant 9.99999993E-9 : f32
    %52 = arith.addf %51, %cst_22 : f32
    %cst_23 = arith.constant 1.000000e+00 : f32
    %53 = arith.divf %cst_23, %52 : f32
    %54 = vector.broadcast %53 : f32 to vector<1x256xf32>
    %55 = arith.mulf %50, %54 : vector<1x256xf32>
    %56 = vector.broadcast %55 : vector<1x256xf32> to vector<16x256xf32>
    %57 = arith.mulf %4, %56 : vector<16x256xf32>
    %c0_24 = arith.constant 0 : index
    %c0_25 = arith.constant 0 : index
    %58 = vector.load %arg10[%c0_24, %c0_25] : memref<32x256xf32, #tpu.memory_space<vmem>>, vector<16x256xf32>
    tpu.vector_store %arg10[%c0_24, %c0_25], %57 {strides = array<i32>} : memref<32x256xf32, #tpu.memory_space<vmem>>, vector<16x256xf32>,
    %c1 = arith.constant 1 : index
    %c0_26 = arith.constant 0 : index
    %c0_27 = arith.constant 0 : index
    %59 = vector.load %arg1[%c1, %c0_26, %c0_27] : memref<2x4x256xf32, #tpu.memory_space<vmem>>, vector<1x4x256xf32>
    %60 = vector.shape_cast %59 : vector<1x4x256xf32> to vector<4x256xf32>
    %cst_28 = arith.constant dense<0.000000e+00> : vector<32x256xf32>
    %61 = tpu.matmul %0, %60, %cst_28 {dimension_numbers = #tpu.dot_dimension_numbers<[1], [0], [0], [1], [0, 0, 1, 1], [], []>} : vector<32x4xf32>, vector<4x256xf32>, vector<32x256xf32> -> vector<32x256xf32>
    %62 = vector.broadcast %1 : vector<32x1xf32> to vector<32x256xf32>
    %63 = arith.addf %61, %62 : vector<32x256xf32>
    %cst_29 = arith.constant 0.000000e+00 : f32
    %64 = vector.broadcast %cst_29 : f32 to vector<32x256xf32>
    %65 = arith.maximumf %63, %64 : vector<32x256xf32>
    %cst_30 = arith.constant dense<0.000000e+00> : vector<10x256xf32>
    %66 = tpu.matmul %2, %65, %cst_30 {dimension_numbers = #tpu.dot_dimension_numbers<[1], [0], [0], [1], [0, 0, 1, 1], [], []>} : vector<10x32xf32>, vector<32x256xf32>, vector<10x256xf32> -> vector<10x256xf32>
    %cst_31 = arith.constant dense<0.000000e+00> : vector<10xf32>
    %67 = vector.multi_reduction <add>, %66, %cst_31 [1] : vector<10x256xf32> to vector<10xf32>
    %68 = vector.shape_cast %67 : vector<10xf32> to vector<10x1xf32>
    %cst_32 = arith.constant 2.560000e+02 : f32
    %69 = vector.broadcast %cst_32 : f32 to vector<10x1xf32>
    %70 = arith.divf %68, %69 : vector<10x1xf32>
    %71 = arith.addf %70, %3 : vector<10x1xf32>
    %72 = vector.shape_cast %71 : vector<10x1xf32> to vector<1x10x1xf32>
    %cst_33 = arith.constant dense<0xFF800000> : vector<1xf32>
    %73 = vector.multi_reduction <maximumf>, %72, %cst_33 [1, 2] : vector<1x10x1xf32> to vector<1xf32>
    %74 = vector.shape_cast %73 : vector<1xf32> to vector<1x1x1xf32>
    %75 = vector.extract %74[0, 0, 0] : f32 from vector<1x1x1xf32>
    %76 = vector.broadcast %75 : f32 to vector<10x1xf32>
    %77 = arith.cmpf oge, %71, %76 : vector<10x1xf32>
    %c10_i32_34 = arith.constant 10 : i32
    %78 = vector.broadcast %c10_i32_34 : i32 to vector<10x1xi32>
    %79 = arith.select %77, %5, %78 : vector<10x1xi1>, vector<10x1xi32>
    %80 = vector.shape_cast %79 : vector<10x1xi32> to vector<1x10x1xi32>
    %cst_35 = arith.constant dense<2147483647> : vector<1xi32>
    %81 = vector.multi_reduction <minsi>, %80, %cst_35 [1, 2] : vector<1x10x1xi32> to vector<1xi32>
    %82 = vector.shape_cast %81 : vector<1xi32> to vector<1x1x1xi32>
    %83 = vector.extract %82[0, 0, 0] : i32 from vector<1x1x1xi32>
    %84 = vector.broadcast %83 : i32 to vector<10x1xi32>
    %85 = arith.cmpi eq, %5, %84 : vector<10x1xi32>
    %86 = arith.extui %85 : vector<10x1xi1> to vector<10x1xi32>
    %87 = arith.sitofp %86 : vector<10x1xi32> to vector<10x1xf32>
    %88 = vector.broadcast %87 : vector<10x1xf32> to vector<10x256xf32>
    %89 = arith.mulf %66, %88 : vector<10x256xf32>
    %cst_36 = arith.constant dense<0.000000e+00> : vector<256xf32>
    %90 = vector.multi_reduction <add>, %89, %cst_36 [0] : vector<10x256xf32> to vector<256xf32>
    %91 = vector.shape_cast %90 : vector<256xf32> to vector<1x256xf32>
    %cst_37 = arith.constant 0.000000e+00 : f32
    %92 = vector.broadcast %cst_37 : f32 to vector<1x256xf32>
    %93 = arith.maximumf %91, %92 : vector<1x256xf32>
    %94 = vector.shape_cast %93 : vector<1x256xf32> to vector<1x1x256xf32>
    %cst_38 = arith.constant dense<0x7F800000> : vector<1xf32>
    %95 = vector.multi_reduction <minimumf>, %94, %cst_38 [1, 2] : vector<1x1x256xf32> to vector<1xf32>
    %96 = vector.shape_cast %95 : vector<1xf32> to vector<1x1x1xf32>
    %97 = vector.extract %96[0, 0, 0] : f32 from vector<1x1x1xf32>
    %98 = vector.shape_cast %93 : vector<1x256xf32> to vector<1x1x256xf32>
    %cst_39 = arith.constant dense<0xFF800000> : vector<1xf32>
    %99 = vector.multi_reduction <maximumf>, %98, %cst_39 [1, 2] : vector<1x1x256xf32> to vector<1xf32>
    %100 = vector.shape_cast %99 : vector<1xf32> to vector<1x1x1xf32>
    %101 = vector.extract %100[0, 0, 0] : f32 from vector<1x1x1xf32>
    %102 = vector.broadcast %97 : f32 to vector<1x256xf32>
    %103 = arith.subf %93, %102 : vector<1x256xf32>
    %104 = arith.subf %101, %97 : f32
    %cst_40 = arith.constant 9.99999993E-9 : f32
    %105 = arith.addf %104, %cst_40 : f32
    %cst_41 = arith.constant 1.000000e+00 : f32
    %106 = arith.divf %cst_41, %105 : f32
    %107 = vector.broadcast %106 : f32 to vector<1x256xf32>
    %108 = arith.mulf %103, %107 : vector<1x256xf32>
    %109 = vector.broadcast %108 : vector<1x256xf32> to vector<16x256xf32>
    %110 = arith.mulf %4, %109 : vector<16x256xf32>
    %c16 = arith.constant 16 : index
    %c0_42 = arith.constant 0 : index
    %111 = vector.load %arg10[%c16, %c0_42] : memref<32x256xf32, #tpu.memory_space<vmem>>, vector<16x256xf32>
    tpu.vector_store %arg10[%c16, %c0_42], %110 {strides = array<i32>} : memref<32x256xf32, #tpu.memory_space<vmem>>, vector<16x256xf32>,
    %c0_43 = arith.constant 0 : index
    %c0_44 = arith.constant 0 : index
    %112 = vector.load %arg10[%c0_43, %c0_44] : memref<32x256xf32, #tpu.memory_space<vmem>>, vector<32x256xf32>
    %c0_45 = arith.constant 0 : index
    %c0_46 = arith.constant 0 : index
    %113 = vector.load %arg7[%c0_45, %c0_46] : memref<256x256xf32, #tpu.memory_space<vmem>>, vector<256x256xf32>
    %cst_47 = arith.constant dense<0.000000e+00> : vector<32x256xf32>
    %114 = tpu.matmul %112, %113, %cst_47 {dimension_numbers = #tpu.dot_dimension_numbers<[1], [0], [0], [1], [0, 0, 1, 1], [], []>} : vector<32x256xf32>, vector<256x256xf32>, vector<32x256xf32> -> vector<32x256xf32>
    %c0_48 = arith.constant 0 : index
    %c0_49 = arith.constant 0 : index
    %115 = vector.load %arg8[%c0_48, %c0_49] : memref<256x16xf32, #tpu.memory_space<vmem>>, vector<256x16xf32>
    %116 = vector.extract_strided_slice %114 {offsets = [0, 0], sizes = [16, 256], strides = [1, 1]} : vector<32x256xf32> to vector<16x256xf32>
    %cst_50 = arith.constant dense<0.000000e+00> : vector<256x256xf32>
    %117 = tpu.matmul %115, %116, %cst_50 {dimension_numbers = #tpu.dot_dimension_numbers<[1], [0], [0], [1], [0, 0, 1, 1], [], []>} : vector<256x16xf32>, vector<16x256xf32>, vector<256x256xf32> -> vector<256x256xf32>
    %c0_51 = arith.constant 0 : index
    %c0_52 = arith.constant 0 : index
    %c0_53 = arith.constant 0 : index
    %118 = vector.load %arg9[%c0_51, %c0_52, %c0_53] : memref<2x256x256xf32, #tpu.memory_space<vmem>>, vector<1x256x256xf32>
    %119 = vector.shape_cast %118 : vector<1x256x256xf32> to vector<256x256xf32>
    %120 = vector.shape_cast %117 : vector<256x256xf32> to vector<1x256x256xf32>
    tpu.vector_store %arg9[%c0_51, %c0_52, %c0_53], %120 {strides = array<i32>} : memref<2x256x256xf32, #tpu.memory_space<vmem>>, vector<1x256x256xf32>,
    %121 = vector.extract_strided_slice %114 {offsets = [16, 0], sizes = [16, 256], strides = [1, 1]} : vector<32x256xf32> to vector<16x256xf32>
    %cst_54 = arith.constant dense<0.000000e+00> : vector<256x256xf32>
    %122 = tpu.matmul %115, %121, %cst_54 {dimension_numbers = #tpu.dot_dimension_numbers<[1], [0], [0], [1], [0, 0, 1, 1], [], []>} : vector<256x16xf32>, vector<16x256xf32>, vector<256x256xf32> -> vector<256x256xf32>
    %c1_55 = arith.constant 1 : index
    %c0_56 = arith.constant 0 : index
    %c0_57 = arith.constant 0 : index
    %123 = vector.load %arg9[%c1_55, %c0_56, %c0_57] : memref<2x256x256xf32, #tpu.memory_space<vmem>>, vector<1x256x256xf32>
    %124 = vector.shape_cast %123 : vector<1x256x256xf32> to vector<256x256xf32>
    %125 = vector.shape_cast %122 : vector<256x256xf32> to vector<1x256x256xf32>
    tpu.vector_store %arg9[%c1_55, %c0_56, %c0_57], %125 {strides = array<i32>} : memref<2x256x256xf32, #tpu.memory_space<vmem>>, vector<1x256x256xf32>,
    return
  }
  func.func @transform_0(%arg0: i32) -> (i32, i32, i32) {
    %c0_i32 = arith.constant 0 : i32
    %c0_i32_0 = arith.constant 0 : i32
    %c0_i32_1 = arith.constant 0 : i32
    return %arg0, %c0_i32, %c0_i32_0 : i32, i32, i32
  }
  func.func @transform_1(%arg0: i32) -> (i32, i32) {
    %c0_i32 = arith.constant 0 : i32
    %c0_i32_0 = arith.constant 0 : i32
    %c0_i32_1 = arith.constant 0 : i32
    return %c0_i32, %c0_i32_0 : i32, i32
  }
  func.func @transform_2(%arg0: i32) -> (i32, i32) {
    %c0_i32 = arith.constant 0 : i32
    %c0_i32_0 = arith.constant 0 : i32
    %c0_i32_1 = arith.constant 0 : i32
    return %c0_i32, %c0_i32_0 : i32, i32
  }
  func.func @transform_3(%arg0: i32) -> (i32, i32) {
    %c0_i32 = arith.constant 0 : i32
    %c0_i32_0 = arith.constant 0 : i32
    %c0_i32_1 = arith.constant 0 : i32
    return %c0_i32, %c0_i32_0 : i32, i32
  }
  func.func @transform_4(%arg0: i32) -> (i32, i32) {
    %c0_i32 = arith.constant 0 : i32
    %c0_i32_0 = arith.constant 0 : i32
    %c0_i32_1 = arith.constant 0 : i32
    return %c0_i32, %c0_i32_0 : i32, i32
  }
  func.func @transform_5(%arg0: i32) -> (i32, i32) {
    %c0_i32 = arith.constant 0 : i32
    %c0_i32_0 = arith.constant 0 : i32
    %c0_i32_1 = arith.constant 0 : i32
    return %c0_i32, %c0_i32_0 : i32, i32
  }
  func.func @transform_6(%arg0: i32) -> (i32, i32) {
    %c0_i32 = arith.constant 0 : i32
    %c0_i32_0 = arith.constant 0 : i32
    %c0_i32_1 = arith.constant 0 : i32
    return %c0_i32, %c0_i32_0 : i32, i32
  }
  func.func @transform_7(%arg0: i32) -> (i32, i32) {
    %c0_i32 = arith.constant 0 : i32
    %c0_i32_0 = arith.constant 0 : i32
    %c0_i32_1 = arith.constant 0 : i32
    return %c0_i32, %c0_i32_0 : i32, i32
  }
  func.func @transform_8(%arg0: i32) -> (i32, i32, i32) {
    %c0_i32 = arith.constant 0 : i32
    %c0_i32_0 = arith.constant 0 : i32
    %c0_i32_1 = arith.constant 0 : i32
    return %arg0, %c0_i32, %c0_i32_0 : i32, i32, i32
  }
}

</mosaic_0001>

<bundles_post_ra>
// kernel: basic_cam_forward.1
= control target key start
LH: loop header
LB: loop body
LE: loop exit
PB: predicated region body
PF: predicated region fallthrough
CT: control target
= control target key end

     0   :  { %13 = vsyncpa [#allocation4], 0  ;;  %s2396_s0 = inlined_call_operand.vmem [shape: f32[2,4,256], index: 0, kind: input, shape index: {}]   ;;  %s2397_s1 = inlined_call_operand.vmem [shape: f32[32,4], index: 1, kind: input, shape index: {}]   ;;  %s2398_s2 = inlined_call_operand.vmem [shape: f32[32,1], index: 2, kind: input, shape index: {}]   ;;  %s2399_s3 = inlined_call_operand.vmem [shape: f32[10,32], index: 3, kind: input, shape index: {}]   ;;  %s2400_s4 = inlined_call_operand.vmem [shape: f32[10,1], index: 4, kind: input, shape index: {}]   ;;  %s2401_s5 = inlined_call_operand.vmem [shape: f32[16,256], index: 5, kind: input, shape index: {}]   ;;  %s2402_s6 = inlined_call_operand.hbm [shape: f32[256,256], index: 6, kind: input, shape index: {}]   ;;  %s2403_s7 = inlined_call_operand.hbm [shape: f32[256,16], index: 7, kind: input, shape index: {}]   ;;  %s2404_s8 = inlined_call_operand.hbm [shape: f32[2,256,256], index: 8, kind: output, shape index: {}]  }
   0x1   :  { %14 = vsyncpa [#allocation7], 0 }
   0x2   :  { %15 = vsyncpa [#allocation5], 0  ;;  %s1854_s27 = smov [#allocation3]  }
   0x3   :  { %s33_s28 = sshll.u32 %s1854_s27, 4  ;;  %s34_s28 = int_to_ptr.vmem [resolvable:$true] %s33_s28 }
   0x4   :  { %s1796_s29 = scalar_lea.vmem %s34_s28, 8192  ;;  %p1801_p1 = scmp.lt.s32.totalorder %s34_s28, %s34_s28 }
   0x5   :  { %p1797_p0 = scmp.ne.s32.totalorder %s34_s28, %s1796_s29  ;;  %p1802_p2 = scmp.lt.s32.totalorder %s1796_s29, %s1796_s29 }
   0x7   :  { %p1803_p3 = por %p1802_p2, %p1801_p1 }
   0x9   :  { %p1804_p4 = pnand %p1803_p3, %p1797_p0 }
   0xb   :  { %1807 = shalt.err (!%p1804_p4)
}
   0xc   :  { %s1855_s30 = smov 256   ;;  %s1856_s9 = smov 16  }
   0xd   :  { %39 = dma.hbm_to_vmem [thread:$0]  %s2402_s6, 8192, %s34_s28, [#allocation4], %s1855_s30, %s1855_s30, %s1856_s9  }
   0xe   :  { %s1857_s12 = smov [#allocation6]  }
   0xf   :  { %s45_s13 = sshll.u32 %s1857_s12, 4  ;;  %s46_s13 = int_to_ptr.vmem [resolvable:$true] %s45_s13 }
  0x10   :  { %s1816_s14 = scalar_lea.vmem %s46_s13, 4096  ;;  %p1821_p6 = scmp.lt.s32.totalorder %s46_s13, %s46_s13 }
  0x11   :  { %p1817_p5 = scmp.ne.s32.totalorder %s46_s13, %s1816_s14  ;;  %p1822_p7 = scmp.lt.s32.totalorder %s1816_s14, %s1816_s14 }
  0x13   :  { %p1823_p8 = por %p1822_p7, %p1821_p6 }
  0x15   :  { %p1824_p9 = pnand %p1823_p8, %p1817_p5 }
  0x17   :  { %1827 = shalt.err (!%p1824_p9)
}
  0x18   :  { %s1858_s15 = smov 128   ;;  %s1859_s16 = smov 8  }
  0x19   :  { %51 = dma.hbm_to_vmem [thread:$0]  %s2403_s7, 4096, %s46_s13, [#allocation7], %s1858_s15, %s1858_s15, %s1859_s16  }
  0x1a   :  { %1848 = dma.done.wait [#allocation4], 8192  }
  0x1b   :  { %1849 = vsyncadd [#allocation4], 4294959104 }
  0x1c   :  { %1850 = dma.done.wait [#allocation7], 4096  }
  0x1d   :  { %1851 = vsyncadd [#allocation7], 4294963200  ;;  %v1860_v0 = vmov 0.0   ;;  %v1861_v1 = vmov 0   ;;  %v77_v2 = vld [vmem:[%s2396_s0] sm:$0xff]  ;;  %vm113_vm0 = vcmask 1043456  }
  0x1e   :  { %182 = vmatprep.mubr.f32.mxu0 %v1860_v0  ;;  %1781 = vset.pattern.permute.xlu1 %v1861_v1  ;;  %v99_v3 = vcombine.high %v77_v2, %v77_v2  ;;  %v63_v4 = vld [vmem:[%s2398_s2 + $0x8] sm:$0xff]  ;;  %v1928_v5 = vld [vmem:[%s2397_s1] sm:$0xff]  ;;  %vm100_vm1 = vcmask 31744   ;;  %v65_v6 = vld [vmem:[%s2398_s2 + $0x18] sm:$0xff]  ;;  %vm215_vm2 = vcmask 261120   ;;  %vm302_vm3 = vcmask 1041408  }
  0x1f   :  { %1780 = vset.pattern.permute.xlu0 %v1861_v1  ;;  %286 = vmatprep.mubr.f32.mxu1 %v1860_v0  ;;  %v62_v7 = vld [vmem:[%s2398_s2] sm:$0xff]  ;;  %v64_v8 = vld [vmem:[%s2398_s2 + $0x10] sm:$0xff]  ;;  %v59_v9 = vld [vmem:[%s2397_s1 + $0x8] sm:$0xff]  ;;  %vm313_vm4 = vcmask 7168   ;;  %vm315_vm5 = vcmask 1024  }
  0x20   :  { %85 = vperm.xlu1 %1781, %v63_v4   ;;  %1662 = vmatprep.subr.msk.mxu0 %vm113_vm0, %v99_v3  ;;  %v60_v10 = vld [vmem:[%s2397_s1 + $0x10] sm:$0xff]  ;;  %v61_v11 = vld [vmem:[%s2397_s1 + $0x18] sm:$0xff]  ;;  %v1672_v36 = vld [vmem:[%s2396_s0 + $0x8] sm:$0xff]  ;;  %s1862_s0 = smov [#allocation8]  }
  0x21   :  { %95 = vperm.xlu0 %1780, %v65_v6   ;;  %1663 = vmatpush1.msk.msra.mxu0 %vm113_vm0, %v77_v2  ;;  %v419_v40 = vcombine.high %v1672_v36, %v1672_v36  ;;  %v66_v42 = vld [vmem:[%s2399_s3] sm:$0xff]  ;;  %v67_v43 = vld [vmem:[%s2399_s3 + $0x8] sm:$0x3]  ;;  %s1649_s17 = sshll.u32 %s1862_s0, 4  ;;  %s1650_s17 = int_to_ptr.vmem [resolvable:$true] %s1649_s17 }
  0x22   :  { %1664 = vmatmul.mubr.msk.f32.vlgmr.msra.gmra.mxu0 %vm100_vm1, %v1928_v5  ;;  %s1828_s3 = scalar_lea.vmem %s1650_s17, 16384  ;;  %p1833_p11 = scmp.lt.s32.totalorder %s1650_s17, %s1650_s17 }
  0x23   :  { %188 = vmatprep.mubr.f32.mxu0 %v1860_v0  ;;  %p1829_p10 = scmp.ne.s32.totalorder %s1650_s17, %s1828_s3  ;;  %p1834_p12 = scmp.lt.s32.totalorder %s1828_s3, %s1828_s3 }
  0x24   :  { %80 = vperm.xlu1 %1781, %v62_v7  }
  0x25   :  { %90 = vperm.xlu0 %1780, %v64_v8   ;;  %p1835_p13 = por %p1834_p12, %p1833_p11 }
  0x26   :  { %1665 = vmatmul.mubr.msk.f32.gmra.mxu0 %vm100_vm1, %v59_v9 }
  0x27   :  { %194 = vmatprep.mubr.f32.mxu0 %v1860_v0  ;;  %p1836_p0 = pnand %p1835_p13, %p1829_p10 }
  0x2a   :  { %1666 = vmatmul.mubr.msk.f32.gmra.mxu0 %vm100_vm1, %v60_v10 }
  0x2b   :  { %200 = vmatprep.mubr.f32.mxu0 %v1860_v0 }
  0x2e   :  { %1667 = vmatmul.mubr.msk.f32.gmra.mxu0 %vm100_vm1, %v61_v11 }
  0x2f   :  { %585 = vmatprep.mubr.f32.mxu0 %v1860_v0 }
  0x9b   :  { %v1961_v19 = vpop.permute.xlu1 %85 }
  0x9c   :  { %v1959_v16 = vpop.permute.xlu0 %95 }
  0x9f   :  { %v1969_v27 = vpop.permute.xlu1 %80 }
  0xa0   :  { %v1963_v21 = vpop.permute.xlu0 %90 }
  0xe2   :  { %v184_v12 = vpop.f32.mrf.mxu0 }
  0xe3   :  { %v185_v34 = vadd.f32 %v184_v12, %v1969_v27 }
  0xe4   :  { %v186_v13 = vpop.f32.mrf.mxu0 }
  0xe5   :  { %v187_v32 = vadd.f32 %v186_v13, %v1969_v27  ;;  %v207_v41 = vmax.f32 %v185_v34, 0.0 }
  0xe6   :  { %v190_v14 = vpop.f32.mrf.mxu0 }
  0xe7   :  { %v191_v30 = vadd.f32 %v190_v14, %v1961_v19  ;;  %v208_v39 = vmax.f32 %v187_v32, 0.0 }
  0xe8   :  { %v192_v15 = vpop.f32.mrf.mxu0 }
  0xe9   :  { %v193_v28 = vadd.f32 %v192_v15, %v1961_v19  ;;  %v209_v38 = vmax.f32 %v191_v30, 0.0  ;;  %v2027_v15 = vld [vmem:[%s2400_s4] sm:$0xff] }
  0xea   :  { %v196_v17 = vpop.f32.mrf.mxu0 }
  0xeb   :  { %v197_v26 = vadd.f32 %v196_v17, %v1963_v21  ;;  %v210_v37 = vmax.f32 %v193_v28, 0.0 }
  0xec   :  { %v198_v18 = vpop.f32.mrf.mxu0 }
  0xed   :  { %v199_v24 = vadd.f32 %v198_v18, %v1963_v21  ;;  %v211_v35 = vmax.f32 %v197_v26, 0.0 }
  0xee   :  { %v202_v20 = vpop.f32.mrf.mxu0 }
  0xef   :  { %v203_v22 = vadd.f32 %v202_v20, %v1959_v16  ;;  %v212_v33 = vmax.f32 %v199_v24, 0.0 }
  0xf0   :  { %v204_v23 = vpop.f32.mrf.mxu0 }
  0xf1   :  { %v205_v25 = vadd.f32 %v204_v23, %v1959_v16  ;;  %v213_v31 = vmax.f32 %v203_v22, 0.0 }
  0xf3   :  { %v214_v29 = vmax.f32 %v205_v25, 0.0 }
  0xf5   :  { %246 = vmatprep.subr.mxu1 %v214_v29 }
  0xf6   :  { %247 = vmatpush1.msra.mxu1 %v213_v31  ;;  %v74_v31 = vlaneseq }
  0xf7   :  { %248 = vmatprep.subr.mxu1 %v212_v33 }
  0xf8   :  { %249 = vmatpush1.msra.mxu1 %v211_v35  ;;  %v2038_v32 = vshrl.u32 %v74_v31, 7 }
  0xf9   :  { %250 = vmatprep.subr.mxu1 %v210_v37 }
  0xfa   :  { %251 = vmatpush1.msra.mxu1 %v209_v38  ;;  %v2041_v33 = vadd.s32 8, %v2038_v32 }
  0xfb   :  { %252 = vmatprep.subr.mxu1 %v208_v39 }
  0xfc   :  { %253 = vmatpush1.msra.mxu1 %v207_v41 }
  0xfd   :  { %1668 = vmatmul.mubr.msk.f32.vlgmr.msra.gmra.mxu1 %vm215_vm2, %v66_v42  ;;  %1673 = vmatprep.subr.msk.mxu1 %vm113_vm0, %v419_v40 }
  0xfe   :  { %292 = vmatprep.mubr.f32.mxu1 %v1860_v0  ;;  %1674 = vmatpush1.msk.msra.mxu1 %vm113_vm0, %v1672_v36 }
 0x101   :  { %1669 = vmatmul.mubr.msk.f32.gmra.mxu1 %vm215_vm2, %v67_v43 }
 0x102   :  { %488 = vmatprep.mubr.f32.mxu1 %v1860_v0 }
 0x105   :  { %1675 = vmatmul.mubr.msk.f32.vlgmr.msra.gmra.mxu1 %vm100_vm1, %v1928_v5 }
 0x106   :  { %494 = vmatprep.mubr.f32.mxu1 %v1860_v0 }
 0x109   :  { %1676 = vmatmul.mubr.msk.f32.gmra.mxu1 %vm100_vm1, %v59_v9 }
 0x10a   :  { %500 = vmatprep.mubr.f32.mxu1 %v1860_v0 }
 0x10d   :  { %1677 = vmatmul.mubr.msk.f32.gmra.mxu1 %vm100_vm1, %v60_v10 }
 0x10e   :  { %506 = vmatprep.mubr.f32.mxu1 %v1860_v0 }
 0x111   :  { %1678 = vmatmul.mubr.msk.f32.gmra.mxu1 %vm100_vm1, %v61_v11 }
 0x1bd   :  { %v1998_v44 = vpop.f32.mrf.mxu1 }
 0x1bf   :  { %v2000_v45 = vpop.f32.mrf.mxu1 }
 0x1c0   :  { %v299_v46 = vadd.f32 %v2000_v45, %v1998_v44 }
 0x1c1   :  { %v2004_v47 = vpop.f32.mrf.mxu1 }
 0x1c2   :  { %300 = vadd.xlane.f32.xlu0 %v299_v46  ;;  %v303_v49 = vsel %vm302_vm3, %v2004_v47, 0.0 }
 0x1c3   :  { %v2006_v48 = vpop.f32.mrf.mxu1 }
 0x1c4   :  { %v304_v50 = vsel %vm302_vm3, %v2006_v48, 0.0 }
 0x1c5   :  { %v490_v51 = vpop.f32.mrf.mxu1  ;;  %v305_v52 = vadd.f32 %v304_v50, %v303_v49 }
 0x1c6   :  { %v491_v7 = vadd.f32 %v490_v51, %v1969_v27 }
 0x1c7   :  { %v492_v53 = vpop.f32.mrf.mxu1  ;;  %306 = vadd.xlane.f32.xlu1 %v305_v52 }
 0x1c8   :  { %v493_v5 = vadd.f32 %v492_v53, %v1969_v27  ;;  %v513_v12 = vmax.f32 %v491_v7, 0.0 }
 0x1c9   :  { %v496_v54 = vpop.f32.mrf.mxu1 }
 0x1ca   :  { %v497_v3 = vadd.f32 %v496_v54, %v1961_v19  ;;  %v514_v11 = vmax.f32 %v493_v5, 0.0 }
 0x1cb   :  { %v498_v55 = vpop.f32.mrf.mxu1 }
 0x1cc   :  { %v499_v1 = vadd.f32 %v498_v55, %v1961_v19  ;;  %v515_v10 = vmax.f32 %v497_v3, 0.0 }
 0x1cd   :  { %v502_v56 = vpop.f32.mrf.mxu1 }
 0x1ce   :  { %v503_v63 = vadd.f32 %v502_v56, %v1963_v21  ;;  %v516_v9 = vmax.f32 %v499_v1, 0.0 }
 0x1cf   :  { %v504_v57 = vpop.f32.mrf.mxu1 }
 0x1d0   :  { %v505_v61 = vadd.f32 %v504_v57, %v1963_v21  ;;  %v517_v8 = vmax.f32 %v503_v63, 0.0 }
 0x1d1   :  { %v508_v58 = vpop.f32.mrf.mxu1 }
 0x1d2   :  { %v509_v59 = vadd.f32 %v508_v58, %v1959_v16  ;;  %v518_v6 = vmax.f32 %v505_v61, 0.0 }
 0x1d3   :  { %v510_v60 = vpop.f32.mrf.mxu1 }
 0x1d4   :  { %v511_v62 = vadd.f32 %v510_v60, %v1959_v16  ;;  %v519_v4 = vmax.f32 %v509_v59, 0.0  ;;  %v2032_v16 = vld [vmem:[%s2400_s4 + $0x8] sm:$0x3] }
 0x1d6   :  { %v520_v2 = vmax.f32 %v511_v62, 0.0 }
 0x1d8   :  { %545 = vmatprep.subr.mxu0 %v520_v2 }
 0x1d9   :  { %546 = vmatpush1.msra.mxu0 %v519_v4 }
 0x1da   :  { %547 = vmatprep.subr.mxu0 %v518_v6 }
 0x1db   :  { %548 = vmatpush1.msra.mxu0 %v517_v8 }
 0x1dc   :  { %549 = vmatprep.subr.mxu0 %v516_v9 }
 0x1dd   :  { %550 = vmatpush1.msra.mxu0 %v515_v10 }
 0x1de   :  { %551 = vmatprep.subr.mxu0 %v514_v11 }
 0x1df   :  { %552 = vmatpush1.msra.mxu0 %v513_v12 }
 0x1e0   :  { %1679 = vmatmul.mubr.msk.f32.vlgmr.msra.gmra.mxu0 %vm215_vm2, %v66_v42 }
 0x1e1   :  { %591 = vmatprep.mubr.f32.mxu0 %v1860_v0 }
 0x1e4   :  { %1680 = vmatmul.mubr.msk.f32.gmra.mxu0 %vm215_vm2, %v67_v43 }
 0x1e5   :  { %1065 = vmatprep.mubr.f32.mxu0 %v1860_v0 }
 0x24b   :  { %v301_v13 = vpop.xlane.xlu0 %300 }
 0x24c   :  { %v309_v14 = vmul.f32 0.00390625, %v301_v13 }
 0x24e   :  { %v311_v18 = vadd.f32 %v309_v14, %v2027_v15 }
 0x250   :  { %v307_v17 = vpop.xlane.xlu1 %306  ;;  %v314_v21 = vsel %vm313_vm4, %v311_v18, -inf }
 0x251   :  { %v310_v19 = vmul.f32 0.00390625, %v307_v17 }
 0x253   :  { %v312_v20 = vadd.f32 %v310_v19, %v2032_v16 }
 0x255   :  { %v316_v22 = vsel %vm315_vm5, %v312_v20, -inf }
 0x256   :  { %v317_v23 = vmax.f32 %v314_v21, %v316_v22 }
 0x258   :  { %318 = vmax.xlane.f32.xlu0 %v317_v23 }
 0x2a0   :  { %v2047_v42 = vpop.f32.mrf.mxu0 }
 0x2a2   :  { %v2049_v43 = vpop.f32.mrf.mxu0 }
 0x2a3   :  { %v598_v46 = vadd.f32 %v2049_v43, %v2047_v42 }
 0x2a4   :  { %v2053_v49 = vpop.f32.mrf.mxu0 }
 0x2a5   :  { %v601_v54 = vsel %vm302_vm3, %v2053_v49, 0.0 }
 0x2a6   :  { %v2055_v51 = vpop.f32.mrf.mxu0 }
 0x2a7   :  { %v602_v55 = vsel %vm302_vm3, %v2055_v51, 0.0 }
 0x2a8   :  { %v603_v57 = vadd.f32 %v602_v55, %v601_v54  ;;  %v744_v54 = vld [vmem:[#allocation3 + $0xc8] sm:$0xff]  ;;  %v743_v55 = vld [vmem:[#allocation3 + $0xc0] sm:$0xff] }
 0x2e1   :  { %v319_v24 = vpop.xlane.xlu0 %318 }
 0x2e2   :  { %v320_v25 = vrot.slane %v319_v24, 4 }
 0x2e4   :  { %v321_v26 = vmax.f32 %v319_v24, %v320_v25 }
 0x2e6   :  { %v322_v27 = vrot.slane %v321_v26, 2 }
 0x2e8   :  { %v323_v28 = vmax.f32 %v321_v26, %v322_v27 }
 0x2ea   :  { %v324_v29 = vrot.slane %v323_v28, 1 }
 0x2ec   :  { %v325_v30 = vmax.f32 %v323_v28, %v324_v29 }
 0x2ee   :  { %1751 = vpush %v325_v30 }
 0x31f   :  { %s1752_s4 = spop %1751 }
 0x320   :  { %v327_v34 = vstv %s1752_s4 }
 0x321   :  { %vm328_vm6 = vcmp.ge.f32.partialorder %v311_v18, %v327_v34  ;;  %vm329_vm7 = vcmp.ge.f32.partialorder %v312_v20, %v327_v34 }
 0x322   :  { %v330_v35 = vsel %vm328_vm6, %v2038_v32, 10  ;;  %v331_v36 = vsel %vm329_vm7, %v2041_v33, 10 }
 0x323   :  { %v332_v37 = vsel %vm313_vm4, %v330_v35, 2147483647  ;;  %v333_v38 = vsel %vm315_vm5, %v331_v36, 2147483647 }
 0x324   :  { %vm334_vm8 = vcmp.lt.s32.totalorder %v332_v37, %v333_v38 }
 0x325   :  { %v335_v39 = vsel %vm334_vm8, %v332_v37, %v333_v38 }
 0x326   :  { %v337_v40 = vshra.s32 %v335_v39, 16  ;;  %v336_v50 = vand.u32 65535, %v335_v39 }
 0x328   :  { %v339_v41 = vcvt.s32.f32 %v337_v40  ;;  %v338_v53 = vcvt.s32.f32 %v336_v50  ;;  %v750_v40 = vld [vmem:[#allocation3 + $0xf8] sm:$0xff]  ;;  %v747_v50 = vld [vmem:[#allocation3 + $0xe0] sm:$0xff] }
 0x329   :  { %783 = vmatprep.subr.mxu1 %v750_v40  ;;  %v761_v40 = vld [vmem:[#allocation3 + $0x150] sm:$0xff] }
 0x32a   :  { %340 = vmin.xlane.f32.xlu0 %v339_v41 }
 0x32e   :  { %599 = vadd.xlane.f32.xlu0 %v598_v46  ;;  %v748_v46 = vld [vmem:[#allocation3 + $0xe8] sm:$0xff] }
 0x3b3   :  { %v341_v52 = vpop.xlane.xlu0 %340 }
 0x3b4   :  { %vm342_vm9 = vcmp.eq.f32.partialorder %v339_v41, %v341_v52  ;;  %v347_v58 = vcvt.f32.s32 %v341_v52  ;;  %v749_v41 = vld [vmem:[#allocation3 + $0xf0] sm:$0xff]  ;;  %v746_v52 = vld [vmem:[#allocation3 + $0xd8] sm:$0xff] }
 0x3b5   :  { %v343_v56 = vsel %vm342_vm9, %v338_v53, inf  ;;  %784 = vmatpush1.msra.mxu1 %v749_v41  ;;  %v745_v53 = vld [vmem:[#allocation3 + $0xd0] sm:$0xff]  ;;  %v760_v41 = vld [vmem:[#allocation3 + $0x148] sm:$0xff] }
 0x3b6   :  { %344 = vmin.xlane.f32.xlu1 %v343_v56  ;;  %v348_v60 = vshll.u32 %v347_v58, 16  ;;  %785 = vmatprep.subr.mxu1 %v748_v46  ;;  %v742_v56 = vld [vmem:[#allocation3 + $0xb8] sm:$0xff]  ;;  %v740_v58 = vld [vmem:[#allocation3 + $0xa8] sm:$0xff]  ;;  %v759_v46 = vld [vmem:[#allocation3 + $0x140] sm:$0xff] }
 0x3b7   :  { %v600_v23 = vpop.xlane.xlu0 %599  ;;  %786 = vmatpush1.msra.mxu1 %v747_v50  ;;  %v758_v50 = vld [vmem:[#allocation3 + $0x138] sm:$0xff] }
 0x3b8   :  { %v606_v26 = vmul.f32 0.00390625, %v600_v23  ;;  %787 = vmatprep.subr.mxu1 %v746_v52  ;;  %v778_v23 = vld [vmem:[#allocation3 + $0x1d8] sm:$0xff]  ;;  %v757_v52 = vld [vmem:[#allocation3 + $0x130] sm:$0xff] }
 0x3b9   :  { %788 = vmatpush1.msra.mxu1 %v745_v53  ;;  %v756_v53 = vld [vmem:[#allocation3 + $0x128] sm:$0xff] }
 0x3ba   :  { %604 = vadd.xlane.f32.xlu1 %v603_v57  ;;  %v2072_v29 = vadd.f32 %v606_v26, %v2027_v15  ;;  %789 = vmatprep.subr.mxu1 %v744_v54  ;;  %v741_v57 = vld [vmem:[#allocation3 + $0xb0] sm:$0xff]  ;;  %v774_v26 = vld [vmem:[#allocation3 + $0x1b8] sm:$0xff]  ;;  %v755_v54 = vld [vmem:[#allocation3 + $0x120] sm:$0xff] }
 0x3bb   :  { %790 = vmatpush1.msra.mxu1 %v743_v55  ;;  %v754_v55 = vld [vmem:[#allocation3 + $0x118] sm:$0xff] }
 0x3bc   :  { %v610_v37 = vsel %vm313_vm4, %v2072_v29, -inf  ;;  %791 = vmatprep.subr.mxu1 %v742_v56  ;;  %v753_v56 = vld [vmem:[#allocation3 + $0x110] sm:$0xff] }
 0x3bd   :  { %792 = vmatpush1.msra.mxu1 %v741_v57  ;;  %v752_v57 = vld [vmem:[#allocation3 + $0x108] sm:$0xff] }
 0x3be   :  { %793 = vmatprep.subr.mxu1 %v740_v58  ;;  %v751_v58 = vld [vmem:[#allocation3 + $0x100] sm:$0xff] }
 0x43f   :  { %v345_v59 = vpop.xlane.xlu1 %344 }
 0x440   :  { %v346_v61 = vcvt.f32.s32 %v345_v59  ;;  %v739_v59 = vld [vmem:[#allocation3 + $0xa0] sm:$0xff] }
 0x441   :  { %794 = vmatpush1.msra.mxu1 %v739_v59 }
 0x442   :  { %v349_v62 = vadd.s32 %v348_v60, %v346_v61  ;;  %v738_v60 = vld [vmem:[#allocation3 + $0x98] sm:$0xff]  ;;  %v737_v61 = vld [vmem:[#allocation3 + $0x90] sm:$0xff] }
 0x443   :  { %v605_v24 = vpop.xlane.xlu1 %604  ;;  %795 = vmatprep.subr.mxu1 %v738_v60 }
 0x444   :  { %v350_v63 = vrot.slane %v349_v62, 4  ;;  %796 = vmatpush1.msra.mxu1 %v737_v61 }
 0x446   :  { %vm351_vm10 = vcmp.lt.s32.totalorder %v349_v62, %v350_v63 }
 0x447   :  { %v352_v1 = vsel %vm351_vm10, %v349_v62, %v350_v63  ;;  %v736_v62 = vld [vmem:[#allocation3 + $0x88] sm:$0xff]  ;;  %v735_v63 = vld [vmem:[#allocation3 + $0x80] sm:$0xff] }
 0x448   :  { %v353_v2 = vrot.slane %v352_v1, 2  ;;  %797 = vmatprep.subr.mxu1 %v736_v62 }
 0x449   :  { %798 = vmatpush1.msra.mxu1 %v735_v63 }
 0x44a   :  { %vm354_vm11 = vcmp.lt.s32.totalorder %v352_v1, %v353_v2 }
 0x44b   :  { %v355_v3 = vsel %vm354_vm11, %v352_v1, %v353_v2  ;;  %v734_v1 = vld [vmem:[#allocation3 + $0x78] sm:$0xff]  ;;  %v733_v2 = vld [vmem:[#allocation3 + $0x70] sm:$0xff] }
 0x44c   :  { %v356_v4 = vrot.slane %v355_v3, 1  ;;  %799 = vmatprep.subr.mxu1 %v734_v1 }
 0x44d   :  { %800 = vmatpush1.msra.mxu1 %v733_v2 }
 0x44e   :  { %vm357_vm12 = vcmp.lt.s32.totalorder %v355_v3, %v356_v4 }
 0x44f   :  { %v358_v5 = vsel %vm357_vm12, %v355_v3, %v356_v4  ;;  %v732_v3 = vld [vmem:[#allocation3 + $0x68] sm:$0xff]  ;;  %v731_v4 = vld [vmem:[#allocation3 + $0x60] sm:$0xff] }
 0x450   :  { %1753 = vpush %v358_v5  ;;  %v730_v5 = vld [vmem:[#allocation3 + $0x58] sm:$0xff]  ;;  %801 = vmatprep.subr.mxu1 %v732_v3 }
 0x451   :  { %802 = vmatpush1.msra.mxu1 %v731_v4 }
 0x452   :  { %803 = vmatprep.subr.mxu1 %v730_v5 }
 0x481   :  { %s1754_s20 = spop %1753 }
 0x482   :  { %v360_v6 = vstv %s1754_s20 }
 0x483   :  { %vm361_vm13 = vcmp.eq.s32.totalorder %v2038_v32, %v360_v6  ;;  %vm362_vm14 = vcmp.eq.s32.totalorder %v2041_v33, %v360_v6  ;;  %v729_v6 = vld [vmem:[#allocation3 + $0x50] sm:$0xff] }
 0x484   :  { %v1670_v7 = vsel %vm361_vm13, 1.0, %v1860_v0  ;;  %v1671_v8 = vsel %vm362_vm14, 1.0, %v1860_v0  ;;  %804 = vmatpush1.msra.mxu1 %v729_v6 }
 0x485   :  { %v367_v9 = vmul.f32 %v1670_v7, %v1998_v44  ;;  %v368_v10 = vmul.f32 %v1670_v7, %v2000_v45  ;;  %v369_v11 = vmul.f32 %v1671_v8, %v2004_v47  ;;  %v370_v12 = vmul.f32 %v1671_v8, %v2006_v48  ;;  %v728_v7 = vld [vmem:[#allocation3 + $0x48] sm:$0xff]  ;;  %v727_v8 = vld [vmem:[#allocation3 + $0x40] sm:$0xff] }
 0x486   :  { %v607_v45 = vmul.f32 0.00390625, %v605_v24  ;;  %805 = vmatprep.subr.mxu1 %v728_v7  ;;  %v777_v24 = vld [vmem:[#allocation3 + $0x1d0] sm:$0xff] }
 0x487   :  { %v371_v13 = vsel %vm302_vm3, %v369_v11, 0.0  ;;  %v379_v14 = vsel %vm302_vm3, %v370_v12, 0.0  ;;  %806 = vmatpush1.msra.mxu1 %v727_v8  ;;  %v724_v11 = vld [vmem:[#allocation3 + $0x28] sm:$0xff]  ;;  %v723_v12 = vld [vmem:[#allocation3 + $0x20] sm:$0xff] }
 0x488   :  { %v372_v17 = vadd.f32 %v371_v13, %v367_v9  ;;  %v380_v18 = vadd.f32 %v379_v14, %v368_v10  ;;  %v2075_v30 = vadd.f32 %v607_v45, %v2032_v16  ;;  %v726_v9 = vld [vmem:[#allocation3 + $0x38] sm:$0xff]  ;;  %v725_v10 = vld [vmem:[#allocation3 + $0x30] sm:$0xff] }
 0x489   :  { %807 = vmatprep.subr.mxu1 %v726_v9  ;;  %v722_v13 = vld [vmem:[#allocation3 + $0x18] sm:$0xff]  ;;  %v721_v14 = vld [vmem:[#allocation3 + $0x10] sm:$0xff] }
 0x48a   :  { %v373_v19 = vrot.slane %v372_v17, 4  ;;  %v381_v20 = vrot.slane %v380_v18, 4  ;;  %v611_v38 = vsel %vm315_vm5, %v2075_v30, -inf  ;;  %808 = vmatpush1.msra.mxu1 %v725_v10  ;;  %v773_v45 = vld [vmem:[#allocation3 + $0x1b0] sm:$0xff]  ;;  %v2094_v10 = vld [vmem:[%s2401_s5] sm:$0xff] }
 0x48b   :  { %v612_v16 = vmax.f32 %v610_v37, %v611_v38  ;;  %809 = vmatprep.subr.mxu1 %v724_v11  ;;  %v766_v37 = vld [vmem:[#allocation3 + $0x178] sm:$0xff]  ;;  %v765_v38 = vld [vmem:[#allocation3 + $0x170] sm:$0xff]  ;;  %v2099_v11 = vld [vmem:[%s2401_s5 + $0x8] sm:$0xff] }
 0x48c   :  { %v374_v21 = vadd.f32 %v373_v19, %v372_v17  ;;  %v382_v22 = vadd.f32 %v381_v20, %v380_v18  ;;  %810 = vmatpush1.msra.mxu1 %v723_v12  ;;  %v720_v17 = vld [vmem:[#allocation3 + $0x8] sm:$0xff]  ;;  %v719_v18 = vld [vmem:[#allocation3] sm:$0xff]  ;;  %v782_v19 = vld [vmem:[#allocation3 + $0x1f8] sm:$0xff] }
 0x48d   :  { %811 = vmatprep.subr.mxu1 %v722_v13  ;;  %v781_v20 = vld [vmem:[#allocation3 + $0x1f0] sm:$0xff] }
 0x48e   :  { %v375_v25 = vrot.slane %v374_v21, 2  ;;  %v383_v44 = vrot.slane %v382_v22, 2  ;;  %812 = vmatpush1.msra.mxu1 %v721_v14 }
 0x48f   :  { %813 = vmatprep.subr.mxu1 %v720_v17 }
 0x490   :  { %v376_v27 = vadd.f32 %v375_v25, %v374_v21  ;;  %v384_v47 = vadd.f32 %v383_v44, %v382_v22  ;;  %814 = vmatpush1.msra.mxu1 %v719_v18  ;;  %v780_v21 = vld [vmem:[#allocation3 + $0x1e8] sm:$0xff]  ;;  %v779_v22 = vld [vmem:[#allocation3 + $0x1e0] sm:$0xff] }
 0x491   :  { %815 = vmatprep.subr.mxu1 %v782_v19  ;;  %v776_v25 = vld [vmem:[#allocation3 + $0x1c8] sm:$0xff]  ;;  %v775_v44 = vld [vmem:[#allocation3 + $0x1c0] sm:$0xff] }
 0x492   :  { %v377_v28 = vrot.slane %v376_v27, 1  ;;  %v385_v48 = vrot.slane %v384_v47, 1  ;;  %816 = vmatpush2.msra.mxu1 %v781_v20 }
 0x493   :  { %817 = vmatprep.subr.mxu1 %v780_v21  ;;  %v2115_v21 = vld [vmem:[%s2401_s5 + $0x10] sm:$0xff] }
 0x494   :  { %v378_v31 = vadd.f32 %v377_v28, %v376_v27  ;;  %v386_v34 = vadd.f32 %v385_v48, %v384_v47  ;;  %818 = vmatpush2.msra.mxu1 %v779_v22  ;;  %v772_v27 = vld [vmem:[#allocation3 + $0x1a8] sm:$0xff]  ;;  %v771_v47 = vld [vmem:[#allocation3 + $0x1a0] sm:$0xff]  ;;  %v770_v28 = vld [vmem:[#allocation3 + $0x198] sm:$0xff] }
 0x495   :  { %819 = vmatprep.subr.mxu1 %v778_v23  ;;  %v769_v48 = vld [vmem:[#allocation3 + $0x190] sm:$0xff] }
 0x496   :  { %v2077_v35 = vmax.f32 %v378_v31, 0.0  ;;  %v2079_v36 = vmax.f32 %v386_v34, 0.0  ;;  %820 = vmatpush2.msra.mxu1 %v777_v24  ;;  %v768_v31 = vld [vmem:[#allocation3 + $0x188] sm:$0xff]  ;;  %v767_v34 = vld [vmem:[#allocation3 + $0x180] sm:$0xff] }
 0x497   :  { %821 = vmatprep.subr.mxu1 %v776_v25 }
 0x498   :  { %v393_v39 = vmax.f32 %v2077_v35, %v2079_v36  ;;  %v389_v15 = vmin.f32 %v2077_v35, %v2079_v36  ;;  %822 = vmatpush2.msra.mxu1 %v775_v44 }
 0x499   :  { %823 = vmatprep.subr.mxu1 %v774_v26 }
 0x49a   :  { %394 = vmax.xlane.f32.xlu1 %v393_v39  ;;  %390 = vmin.xlane.f32.xlu0 %v389_v15  ;;  %v764_v39 = vld [vmem:[#allocation3 + $0x168] sm:$0xff]  ;;  %v763_v15 = vld [vmem:[#allocation3 + $0x160] sm:$0xff] }
 0x49b   :  { %824 = vmatpush2.msra.mxu1 %v773_v45 }
 0x49c   :  { %825 = vmatprep.subr.mxu1 %v772_v27 }
 0x49d   :  { %826 = vmatpush2.msra.mxu1 %v771_v47 }
 0x49e   :  { %613 = vmax.xlane.f32.xlu0 %v612_v16  ;;  %827 = vmatprep.subr.mxu1 %v770_v28  ;;  %v762_v16 = vld [vmem:[#allocation3 + $0x158] sm:$0xff] }
 0x49f   :  { %828 = vmatpush2.msra.mxu1 %v769_v48 }
 0x4a0   :  { %829 = vmatprep.subr.mxu1 %v768_v31 }
 0x4a1   :  { %830 = vmatpush2.msra.mxu1 %v767_v34 }
 0x4a2   :  { %831 = vmatprep.subr.mxu1 %v766_v37 }
 0x4a3   :  { %832 = vmatpush2.msra.mxu1 %v765_v38 }
 0x4a4   :  { %833 = vmatprep.subr.mxu1 %v764_v39 }
 0x4a5   :  { %834 = vmatpush2.msra.mxu1 %v763_v15 }
 0x4a6   :  { %835 = vmatprep.subr.mxu1 %v762_v16 }
 0x4a7   :  { %836 = vmatpush2.msra.mxu1 %v761_v40 }
 0x4a8   :  { %837 = vmatprep.subr.mxu1 %v760_v41 }
 0x4a9   :  { %838 = vmatpush2.msra.mxu1 %v759_v46 }
 0x4aa   :  { %839 = vmatprep.subr.mxu1 %v758_v50 }
 0x4ab   :  { %840 = vmatpush2.msra.mxu1 %v757_v52 }
 0x4ac   :  { %841 = vmatprep.subr.mxu1 %v756_v53 }
 0x4ad   :  { %842 = vmatpush2.msra.mxu1 %v755_v54 }
 0x4ae   :  { %843 = vmatprep.subr.mxu1 %v754_v55 }
 0x4af   :  { %844 = vmatpush2.msra.mxu1 %v753_v56 }
 0x4b0   :  { %845 = vmatprep.subr.mxu1 %v752_v57 }
 0x4b1   :  { %846 = vmatpush2.msra.mxu1 %v751_v58 }
 0x523   :  { %v391_v59 = vpop.xlane.xlu0 %390  ;;  %v395_v60 = vpop.xlane.xlu1 %394 }
 0x524   :  { %1755 = vpush %v391_v59 }
 0x525   :  { %1757 = vpush %v395_v60 }
 0x527   :  { %v614_v61 = vpop.xlane.xlu0 %613 }
 0x528   :  { %v615_v62 = vrot.slane %v614_v61, 4 }
 0x52a   :  { %v616_v63 = vmax.f32 %v614_v61, %v615_v62 }
 0x52c   :  { %v617_v2 = vrot.slane %v616_v63, 2 }
 0x52e   :  { %v618_v3 = vmax.f32 %v616_v63, %v617_v2 }
 0x530   :  { %v619_v4 = vrot.slane %v618_v3, 1 }
 0x532   :  { %v620_v6 = vmax.f32 %v618_v3, %v619_v4 }
 0x555   :  { %s1756_s7 = spop %1755 }
 0x556   :  { %s1758_s21 = spop %1757  ;;  %v397_v7 = vstv %s1756_s7 }
 0x557   :  { %s400_s22 = ssub.f32 %s1758_s21, %s1756_s7  ;;  %v398_v8 = vsub.f32 %v2077_v35, %v397_v7  ;;  %v399_v9 = vsub.f32 %v2079_v36, %v397_v7  ;;  %v2104_v35 = vld [vmem:[%s2401_s5 + $0x18] sm:$0xff] }
 0x559   :  { %s401_s23 = sadd.f32 1e-08, %s400_s22 }
 0x55b   :  { %v402_v1 = vstv %s401_s23 }
 0x55c   :  { %1784 = vrcp.f32 %v402_v1 }
 0x569   :  { %v1785_v5 = vpop.eup %1784 }
 0x56a   :  { %1759 = vpush %v1785_v5 }
 0x56b   :  { %1761 = vpush %v620_v6 }
 0x59b   :  { %s1760_s24 = spop %1759 }
 0x59c   :  { %v405_v12 = vstv %s1760_s24  ;;  %s1762_s29 = spop %1761 }
 0x59d   :  { %v406_v13 = vmul.f32 %v405_v12, %v398_v8  ;;  %v407_v14 = vmul.f32 %v405_v12, %v399_v9  ;;  %v622_v17 = vstv %s1762_s29 }
 0x59e   :  { %vm623_vm15 = vcmp.ge.f32.partialorder %v2072_v29, %v622_v17  ;;  %vm624_vm0 = vcmp.ge.f32.partialorder %v2075_v30, %v622_v17 }
 0x59f   :  { %v408_v36 = vmul.f32 %v406_v13, %v2094_v10  ;;  %v409_v18 = vmul.f32 %v407_v14, %v2099_v11  ;;  %v625_v19 = vsel %vm623_vm15, %v2038_v32, 10  ;;  %v626_v20 = vsel %vm624_vm0, %v2041_v33, 10 }
 0x5a0   :  { %v411_v22 = vmul.f32 %v407_v14, %v2104_v35  ;;  %v627_v23 = vsel %vm313_vm4, %v625_v19, 2147483647  ;;  %v628_v29 = vsel %vm315_vm5, %v626_v20, 2147483647  ;;  %v410_v24 = vmul.f32 %v406_v13, %v2115_v21 }
 0x5a1   :  { %847 = vmatprep.mubr.f32.mxu1 %v409_v18  ;;  %vm629_vm1 = vcmp.lt.s32.totalorder %v627_v23, %v628_v29 }
 0x5a2   :  { %848 = vmatmul.mubr.f32.vlgmr.msra.gmra.mxu1 %v408_v36  ;;  %v630_v30 = vsel %vm629_vm1, %v627_v23, %v628_v29 }
 0x5a3   :  { %853 = vmatprep.mubr.f32.mxu1 %v411_v22  ;;  %v632_v25 = vshra.s32 %v630_v30, 16  ;;  %v631_v26 = vand.u32 65535, %v630_v30 }
 0x5a5   :  { %v634_v44 = vcvt.s32.f32 %v632_v25  ;;  %v633_v27 = vcvt.s32.f32 %v631_v26 }
 0x5a6   :  { %854 = vmatmul.mubr.f32.gmra.mxu1 %v410_v24 }
 0x5a7   :  { %635 = vmin.xlane.f32.xlu1 %v634_v44 }
 0x630   :  { %v636_v45 = vpop.xlane.xlu1 %635 }
 0x631   :  { %vm637_vm2 = vcmp.eq.f32.partialorder %v634_v44, %v636_v45  ;;  %v642_v37 = vcvt.f32.s32 %v636_v45  ;;  %v2136_v45 = vld [vmem:[#allocation6] sm:$0xff] }
 0x632   :  { %v638_v47 = vsel %vm637_vm2, %v633_v27, inf  ;;  %v2161_v27 = vld [vmem:[#allocation6 + $0x28] sm:$0xff] }
 0x633   :  { %639 = vmin.xlane.f32.xlu0 %v638_v47  ;;  %v643_v39 = vshll.u32 %v642_v37, 16  ;;  %v2166_v47 = vld [vmem:[#allocation6 + $0x30] sm:$0xff]  ;;  %v2191_v37 = vld [vmem:[#allocation6 + $0x58] sm:$0xff] }
 0x662   :  { %v849_v28 = vpop.f32.mrf.mxu1 }
 0x664   :  { %v851_v48 = vpop.f32.mrf.mxu1 }
 0x666   :  { %v855_v31 = vpop.f32.mrf.mxu1 }
 0x668   :  { %v857_v34 = vpop.f32.mrf.mxu1 }
 0x669   :  { %1029 = vmatprep.subr.mxu0 %v857_v34  ;;  %v2186_v34 = vld [vmem:[#allocation6 + $0x50] sm:$0xff] }
 0x66a   :  { %1030 = vmatpush1.msra.mxu0 %v855_v31  ;;  %v2181_v31 = vld [vmem:[#allocation6 + $0x48] sm:$0xff] }
 0x66b   :  { %1031 = vmatprep.subr.mxu0 %v851_v48  ;;  %v2176_v48 = vld [vmem:[#allocation6 + $0x40] sm:$0xff] }
 0x66c   :  { %1032 = vmatpush1.msra.mxu0 %v849_v28  ;;  %v2171_v28 = vld [vmem:[#allocation6 + $0x38] sm:$0xff] }
 0x6bc   :  { %v640_v38 = vpop.xlane.xlu0 %639 }
 0x6bd   :  { %v641_v15 = vcvt.f32.s32 %v640_v38  ;;  %v2196_v38 = vld [vmem:[#allocation6 + $0x60] sm:$0xff] }
 0x6bf   :  { %v644_v16 = vadd.s32 %v643_v39, %v641_v15  ;;  %v2201_v39 = vld [vmem:[#allocation6 + $0x68] sm:$0xff]  ;;  %v2206_v15 = vld [vmem:[#allocation6 + $0x70] sm:$0xff] }
 0x6c1   :  { %v645_v40 = vrot.slane %v644_v16, 4 }
 0x6c3   :  { %vm646_vm4 = vcmp.lt.s32.totalorder %v644_v16, %v645_v40 }
 0x6c4   :  { %v647_v41 = vsel %vm646_vm4, %v644_v16, %v645_v40  ;;  %v2211_v16 = vld [vmem:[#allocation6 + $0x78] sm:$0xff]  ;;  %v2216_v40 = vld [vmem:[#allocation6 + $0x80] sm:$0xff] }
 0x6c5   :  { %v648_v46 = vrot.slane %v647_v41, 2 }
 0x6c7   :  { %vm649_vm5 = vcmp.lt.s32.totalorder %v647_v41, %v648_v46 }
 0x6c8   :  { %v650_v50 = vsel %vm649_vm5, %v647_v41, %v648_v46  ;;  %v2221_v41 = vld [vmem:[#allocation6 + $0x88] sm:$0xff]  ;;  %v2226_v46 = vld [vmem:[#allocation6 + $0x90] sm:$0xff] }
 0x6c9   :  { %v651_v52 = vrot.slane %v650_v50, 1 }
 0x6cb   :  { %vm652_vm6 = vcmp.lt.s32.totalorder %v650_v50, %v651_v52 }
 0x6cc   :  { %v653_v53 = vsel %vm652_vm6, %v650_v50, %v651_v52  ;;  %v2231_v50 = vld [vmem:[#allocation6 + $0x98] sm:$0xff]  ;;  %v2236_v52 = vld [vmem:[#allocation6 + $0xa0] sm:$0xff] }
 0x6cd   :  { %1763 = vpush %v653_v53  ;;  %v2241_v53 = vld [vmem:[#allocation6 + $0xa8] sm:$0xff] }
 0x6fe   :  { %s1764_s5 = spop %1763 }
 0x6ff   :  { %v655_v54 = vstv %s1764_s5 }
 0x700   :  { %vm656_vm7 = vcmp.eq.s32.totalorder %v2038_v32, %v655_v54  ;;  %vm657_vm8 = vcmp.eq.s32.totalorder %v2041_v33, %v655_v54  ;;  %v2246_v54 = vld [vmem:[#allocation6 + $0xb0] sm:$0xff] }
 0x701   :  { %v1681_v55 = vsel %vm656_vm7, 1.0, %v1860_v0  ;;  %v1682_v56 = vsel %vm657_vm8, 1.0, %v1860_v0 }
 0x702   :  { %v662_v57 = vmul.f32 %v1681_v55, %v2047_v42  ;;  %v663_v58 = vmul.f32 %v1681_v55, %v2049_v43  ;;  %v664_v59 = vmul.f32 %v1682_v56, %v2053_v49  ;;  %v665_v60 = vmul.f32 %v1682_v56, %v2055_v51  ;;  %v2251_v55 = vld [vmem:[#allocation6 + $0xb8] sm:$0xff]  ;;  %v2256_v56 = vld [vmem:[#allocation6 + $0xc0] sm:$0xff] }
 0x704   :  { %v666_v61 = vsel %vm302_vm3, %v664_v59, 0.0  ;;  %v674_v62 = vsel %vm302_vm3, %v665_v60, 0.0  ;;  %vm904_vm3 = vcmask 130048   ;;  %v2271_v59 = vld [vmem:[#allocation6 + $0xd8] sm:$0xff]  ;;  %v2276_v60 = vld [vmem:[#allocation6 + $0xe0] sm:$0xff] }
 0x705   :  { %v667_v63 = vadd.f32 %v666_v61, %v662_v57  ;;  %v675_v32 = vadd.f32 %v674_v62, %v663_v58  ;;  %1683 = vmatmul.mubr.msk.f32.vlgmr.msra.gmra.mxu0 %vm904_vm3, %v2136_v45  ;;  %v2261_v57 = vld [vmem:[#allocation6 + $0xc8] sm:$0xff]  ;;  %v2266_v58 = vld [vmem:[#allocation6 + $0xd0] sm:$0xff] }
 0x706   :  { %1071 = vmatprep.mubr.f32.mxu0 %v1860_v0  ;;  %v2281_v61 = vld [vmem:[#allocation6 + $0xe8] sm:$0xff]  ;;  %v2286_v62 = vld [vmem:[#allocation6 + $0xf0] sm:$0xff] }
 0x707   :  { %v668_v1 = vrot.slane %v667_v63, 4  ;;  %v676_v33 = vrot.slane %v675_v32, 4 }
 0x709   :  { %v669_v2 = vadd.f32 %v668_v1, %v667_v63  ;;  %v677_v3 = vadd.f32 %v676_v33, %v675_v32  ;;  %v2291_v63 = vld [vmem:[#allocation6 + $0xf8] sm:$0xff] }
 0x70b   :  { %v670_v4 = vrot.slane %v669_v2, 2  ;;  %v678_v5 = vrot.slane %v677_v3, 2 }
 0x70d   :  { %v671_v6 = vadd.f32 %v670_v4, %v669_v2  ;;  %v679_v42 = vadd.f32 %v678_v5, %v677_v3 }
 0x70f   :  { %v672_v7 = vrot.slane %v671_v6, 1  ;;  %v680_v43 = vrot.slane %v679_v42, 1 }
 0x711   :  { %v673_v8 = vadd.f32 %v672_v7, %v671_v6  ;;  %v681_v49 = vadd.f32 %v680_v43, %v679_v42 }
 0x713   :  { %v682_v9 = vmax.f32 %v673_v8, 0.0  ;;  %v683_v51 = vmax.f32 %v681_v49, 0.0 }
 0x715   :  { %v688_v12 = vmax.f32 %v682_v9, %v683_v51  ;;  %v684_v13 = vmin.f32 %v682_v9, %v683_v51 }
 0x717   :  { %689 = vmax.xlane.f32.xlu0 %v688_v12  ;;  %685 = vmin.xlane.f32.xlu1 %v684_v13 }
 0x7a0   :  { %v690_v14 = vpop.xlane.xlu0 %689  ;;  %v686_v17 = vpop.xlane.xlu1 %685 }
 0x7a1   :  { %1765 = vpush %v686_v17 }
 0x7a2   :  { %1767 = vpush %v690_v14 }
 0x7c5   :  { %v1067_v3 = vpop.f32.mrf.mxu0 }
 0x7c6   :  { %1258 = vst [vmem:[#allocation8] sm:$0xff] %v1067_v3 }
 0x7c7   :  { %v1069_v4 = vpop.f32.mrf.mxu0 }
 0x7c8   :  { %1259 = vst [vmem:[#allocation8 + $0x8] sm:$0xff] %v1069_v4 }
 0x7d2   :  { %s1766_s13 = spop %1765 }
 0x7d3   :  { %s1768_s1 = spop %1767  ;;  %v692_v19 = vstv %s1766_s13 }
 0x7d4   :  { %s695_s14 = ssub.f32 %s1768_s1, %s1766_s13  ;;  %v693_v20 = vsub.f32 %v682_v9, %v692_v19  ;;  %v694_v22 = vsub.f32 %v683_v51, %v692_v19 }
 0x7d6   :  { %s696_s15 = sadd.f32 1e-08, %s695_s14 }
 0x7d8   :  { %v697_v36 = vstv %s696_s15 }
 0x7d9   :  { %1786 = vrcp.f32 %v697_v36 }
 0x7e6   :  { %v1787_v18 = vpop.eup %1786 }
 0x7e7   :  { %1769 = vpush %v1787_v18 }
 0x818   :  { %s1770_s16 = spop %1769 }
 0x819   :  { %v700_v23 = vstv %s1770_s16 }
 0x81a   :  { %v701_v29 = vmul.f32 %v700_v23, %v693_v20  ;;  %v702_v30 = vmul.f32 %v700_v23, %v694_v22 }
 0x81c   :  { %v703_v24 = vmul.f32 %v701_v29, %v2094_v10  ;;  %v704_v25 = vmul.f32 %v702_v30, %v2099_v11  ;;  %v706_v44 = vmul.f32 %v702_v30, %v2104_v35  ;;  %v705_v26 = vmul.f32 %v701_v29, %v2115_v21  ;;  %v2141_v10 = vld [vmem:[#allocation6 + $0x8] sm:$0xff]  ;;  %v2146_v11 = vld [vmem:[#allocation6 + $0x10] sm:$0xff]  ;;  %v2151_v35 = vld [vmem:[#allocation6 + $0x18] sm:$0xff] }
 0x81d   :  { %1684 = vmatmul.mubr.msk.f32.gmra.mxu0 %vm904_vm3, %v2141_v10  ;;  %v2156_v21 = vld [vmem:[#allocation6 + $0x20] sm:$0xff] }
 0x81e   :  { %859 = vmatprep.mubr.f32.mxu1 %v704_v25  ;;  %1077 = vmatprep.mubr.f32.mxu0 %v1860_v0 }
 0x81f   :  { %860 = vmatmul.mubr.f32.gmra.mxu1 %v703_v24 }
 0x820   :  { %865 = vmatprep.mubr.f32.mxu1 %v706_v44 }
 0x821   :  { %1685 = vmatmul.mubr.msk.f32.gmra.mxu0 %vm904_vm3, %v2146_v11 }
 0x822   :  { %1083 = vmatprep.mubr.f32.mxu0 %v1860_v0 }
 0x823   :  { %866 = vmatmul.mubr.f32.gmra.mxu1 %v705_v26 }
 0x824   :  { %1434 = vmatprep.mubr.f32.mxu1 %v1860_v0 }
 0x825   :  { %1686 = vmatmul.mubr.msk.f32.gmra.mxu0 %vm904_vm3, %v2151_v35 }
 0x826   :  { %1089 = vmatprep.mubr.f32.mxu0 %v1860_v0 }
 0x829   :  { %1687 = vmatmul.mubr.msk.f32.gmra.mxu0 %vm904_vm3, %v2156_v21 }
 0x82a   :  { %1095 = vmatprep.mubr.f32.mxu0 %v1860_v0 }
 0x82d   :  { %1688 = vmatmul.mubr.msk.f32.gmra.mxu0 %vm904_vm3, %v2161_v27 }
 0x82e   :  { %1101 = vmatprep.mubr.f32.mxu0 %v1860_v0 }
 0x831   :  { %1689 = vmatmul.mubr.msk.f32.gmra.mxu0 %vm904_vm3, %v2166_v47 }
 0x832   :  { %1107 = vmatprep.mubr.f32.mxu0 %v1860_v0 }
 0x835   :  { %1690 = vmatmul.mubr.msk.f32.gmra.mxu0 %vm904_vm3, %v2171_v28 }
 0x836   :  { %1113 = vmatprep.mubr.f32.mxu0 %v1860_v0 }
 0x839   :  { %1691 = vmatmul.mubr.msk.f32.gmra.mxu0 %vm904_vm3, %v2176_v48 }
 0x83a   :  { %1119 = vmatprep.mubr.f32.mxu0 %v1860_v0 }
 0x83d   :  { %1692 = vmatmul.mubr.msk.f32.gmra.mxu0 %vm904_vm3, %v2181_v31 }
 0x83e   :  { %1125 = vmatprep.mubr.f32.mxu0 %v1860_v0 }
 0x841   :  { %1693 = vmatmul.mubr.msk.f32.gmra.mxu0 %vm904_vm3, %v2186_v34 }
 0x842   :  { %1131 = vmatprep.mubr.f32.mxu0 %v1860_v0 }
 0x845   :  { %1694 = vmatmul.mubr.msk.f32.gmra.mxu0 %vm904_vm3, %v2191_v37 }
 0x846   :  { %1137 = vmatprep.mubr.f32.mxu0 %v1860_v0 }
 0x849   :  { %1695 = vmatmul.mubr.msk.f32.gmra.mxu0 %vm904_vm3, %v2196_v38 }
 0x84a   :  { %1143 = vmatprep.mubr.f32.mxu0 %v1860_v0 }
 0x84d   :  { %1696 = vmatmul.mubr.msk.f32.gmra.mxu0 %vm904_vm3, %v2201_v39 }
 0x84e   :  { %1149 = vmatprep.mubr.f32.mxu0 %v1860_v0 }
 0x851   :  { %1697 = vmatmul.mubr.msk.f32.gmra.mxu0 %vm904_vm3, %v2206_v15 }
 0x852   :  { %1155 = vmatprep.mubr.f32.mxu0 %v1860_v0 }
 0x855   :  { %1698 = vmatmul.mubr.msk.f32.gmra.mxu0 %vm904_vm3, %v2211_v16 }
 0x856   :  { %1161 = vmatprep.mubr.f32.mxu0 %v1860_v0 }
 0x859   :  { %1699 = vmatmul.mubr.msk.f32.gmra.mxu0 %vm904_vm3, %v2216_v40 }
 0x85a   :  { %1167 = vmatprep.mubr.f32.mxu0 %v1860_v0 }
 0x85d   :  { %1700 = vmatmul.mubr.msk.f32.gmra.mxu0 %vm904_vm3, %v2221_v41 }
 0x85e   :  { %1173 = vmatprep.mubr.f32.mxu0 %v1860_v0 }
 0x861   :  { %1701 = vmatmul.mubr.msk.f32.gmra.mxu0 %vm904_vm3, %v2226_v46 }
 0x862   :  { %1179 = vmatprep.mubr.f32.mxu0 %v1860_v0 }
 0x865   :  { %1702 = vmatmul.mubr.msk.f32.gmra.mxu0 %vm904_vm3, %v2231_v50 }
 0x866   :  { %1185 = vmatprep.mubr.f32.mxu0 %v1860_v0 }
 0x869   :  { %1703 = vmatmul.mubr.msk.f32.gmra.mxu0 %vm904_vm3, %v2236_v52 }
 0x86a   :  { %1191 = vmatprep.mubr.f32.mxu0 %v1860_v0 }
 0x86d   :  { %1704 = vmatmul.mubr.msk.f32.gmra.mxu0 %vm904_vm3, %v2241_v53 }
 0x86e   :  { %1197 = vmatprep.mubr.f32.mxu0 %v1860_v0 }
 0x871   :  { %1705 = vmatmul.mubr.msk.f32.gmra.mxu0 %vm904_vm3, %v2246_v54 }
 0x872   :  { %1203 = vmatprep.mubr.f32.mxu0 %v1860_v0 }
 0x875   :  { %1706 = vmatmul.mubr.msk.f32.gmra.mxu0 %vm904_vm3, %v2251_v55 }
 0x876   :  { %1209 = vmatprep.mubr.f32.mxu0 %v1860_v0 }
 0x879   :  { %1707 = vmatmul.mubr.msk.f32.gmra.mxu0 %vm904_vm3, %v2256_v56 }
 0x87a   :  { %1215 = vmatprep.mubr.f32.mxu0 %v1860_v0 }
 0x87d   :  { %1708 = vmatmul.mubr.msk.f32.gmra.mxu0 %vm904_vm3, %v2261_v57 }
 0x87e   :  { %1221 = vmatprep.mubr.f32.mxu0 %v1860_v0 }
 0x881   :  { %1709 = vmatmul.mubr.msk.f32.gmra.mxu0 %vm904_vm3, %v2266_v58 }
 0x882   :  { %1227 = vmatprep.mubr.f32.mxu0 %v1860_v0 }
 0x885   :  { %1710 = vmatmul.mubr.msk.f32.gmra.mxu0 %vm904_vm3, %v2271_v59 }
 0x886   :  { %1233 = vmatprep.mubr.f32.mxu0 %v1860_v0 }
 0x889   :  { %1711 = vmatmul.mubr.msk.f32.gmra.mxu0 %vm904_vm3, %v2276_v60 }
 0x88a   :  { %1239 = vmatprep.mubr.f32.mxu0 %v1860_v0 }
 0x88d   :  { %1712 = vmatmul.mubr.msk.f32.gmra.mxu0 %vm904_vm3, %v2281_v61 }
 0x88e   :  { %1245 = vmatprep.mubr.f32.mxu0 %v1860_v0 }
 0x891   :  { %1713 = vmatmul.mubr.msk.f32.gmra.mxu0 %vm904_vm3, %v2286_v62 }
 0x892   :  { %1251 = vmatprep.mubr.f32.mxu0 %v1860_v0 }
 0x895   :  { %1714 = vmatmul.mubr.msk.f32.gmra.mxu0 %vm904_vm3, %v2291_v63 }
 0x896   :  { %1386 = vmatprep.mubr.f32.mxu0 %v1860_v0 }
 0x8dd   :  { %v1073_v5 = vpop.f32.mrf.mxu0 }
 0x8de   :  { %1260 = vst [vmem:[#allocation8 + $0x10] sm:$0xff] %v1073_v5 }
 0x8df   :  { %v861_v32 = vpop.f32.mrf.mxu1  ;;  %v1075_v6 = vpop.f32.mrf.mxu0 }
 0x8e0   :  { %1261 = vst [vmem:[#allocation8 + $0x18] sm:$0xff] %v1075_v6 }
 0x8e1   :  { %v863_v1 = vpop.f32.mrf.mxu1  ;;  %v1079_v42 = vpop.f32.mrf.mxu0 }
 0x8e2   :  { %1262 = vst [vmem:[#allocation8 + $0x20] sm:$0xff] %v1079_v42 }
 0x8e3   :  { %v867_v33 = vpop.f32.mrf.mxu1  ;;  %v1081_v7 = vpop.f32.mrf.mxu0 }
 0x8e4   :  { %1263 = vst [vmem:[#allocation8 + $0x28] sm:$0xff] %v1081_v7 }
 0x8e5   :  { %v869_v2 = vpop.f32.mrf.mxu1  ;;  %v1085_v43 = vpop.f32.mrf.mxu0 }
 0x8e6   :  { %1350 = vmatprep.subr.mxu0 %v869_v2  ;;  %1747 = vmatprep.subr.mxu1 %v869_v2  ;;  %1264 = vst [vmem:[#allocation8 + $0x30] sm:$0xff] %v1085_v43 }
 0x8e7   :  { %1351 = vmatpush1.msra.mxu0 %v867_v33  ;;  %1749 = vmatpush1.msra.mxu1 %v867_v33  ;;  %v1087_v8 = vpop.f32.mrf.mxu0 }
 0x8e8   :  { %1352 = vmatprep.subr.mxu0 %v863_v1  ;;  %1748 = vmatprep.subr.mxu1 %v863_v1  ;;  %1265 = vst [vmem:[#allocation8 + $0x38] sm:$0xff] %v1087_v8 }
 0x8e9   :  { %1353 = vmatpush1.msra.mxu0 %v861_v32  ;;  %1750 = vmatpush1.msra.mxu1 %v861_v32  ;;  %v1091_v49 = vpop.f32.mrf.mxu0 }
 0x8ea   :  { %1723 = vmatmul.mubr.msk.f32.vlgmr.msra.gmra.mxu1 %vm904_vm3, %v2176_v48  ;;  %1715 = vmatmul.mubr.msk.f32.vlgmr.msra.gmra.mxu0 %vm904_vm3, %v2136_v45  ;;  %1266 = vst [vmem:[#allocation8 + $0x40] sm:$0xff] %v1091_v49 }
 0x8eb   :  { %1440 = vmatprep.mubr.f32.mxu1 %v1860_v0  ;;  %1392 = vmatprep.mubr.f32.mxu0 %v1860_v0  ;;  %v1093_v9 = vpop.f32.mrf.mxu0 }
 0x8ec   :  { %1267 = vst [vmem:[#allocation8 + $0x48] sm:$0xff] %v1093_v9 }
 0x8ed   :  { %v1097_v51 = vpop.f32.mrf.mxu0 }
 0x8ee   :  { %1724 = vmatmul.mubr.msk.f32.gmra.mxu1 %vm904_vm3, %v2181_v31  ;;  %1716 = vmatmul.mubr.msk.f32.gmra.mxu0 %vm904_vm3, %v2141_v10  ;;  %1268 = vst [vmem:[#allocation8 + $0x50] sm:$0xff] %v1097_v51 }
 0x8ef   :  { %1446 = vmatprep.mubr.f32.mxu1 %v1860_v0  ;;  %1398 = vmatprep.mubr.f32.mxu0 %v1860_v0  ;;  %v1099_v12 = vpop.f32.mrf.mxu0 }
 0x8f0   :  { %1269 = vst [vmem:[#allocation8 + $0x58] sm:$0xff] %v1099_v12 }
 0x8f1   :  { %v1103_v13 = vpop.f32.mrf.mxu0 }
 0x8f2   :  { %1725 = vmatmul.mubr.msk.f32.gmra.mxu1 %vm904_vm3, %v2186_v34  ;;  %1717 = vmatmul.mubr.msk.f32.gmra.mxu0 %vm904_vm3, %v2146_v11  ;;  %1270 = vst [vmem:[#allocation8 + $0x60] sm:$0xff] %v1103_v13 }
 0x8f3   :  { %1452 = vmatprep.mubr.f32.mxu1 %v1860_v0  ;;  %1404 = vmatprep.mubr.f32.mxu0 %v1860_v0  ;;  %v1105_v14 = vpop.f32.mrf.mxu0 }
 0x8f4   :  { %1271 = vst [vmem:[#allocation8 + $0x68] sm:$0xff] %v1105_v14 }
 0x8f5   :  { %v1109_v17 = vpop.f32.mrf.mxu0 }
 0x8f6   :  { %1726 = vmatmul.mubr.msk.f32.gmra.mxu1 %vm904_vm3, %v2191_v37  ;;  %1718 = vmatmul.mubr.msk.f32.gmra.mxu0 %vm904_vm3, %v2151_v35  ;;  %1272 = vst [vmem:[#allocation8 + $0x70] sm:$0xff] %v1109_v17 }
 0x8f7   :  { %1458 = vmatprep.mubr.f32.mxu1 %v1860_v0  ;;  %1410 = vmatprep.mubr.f32.mxu0 %v1860_v0  ;;  %v1111_v36 = vpop.f32.mrf.mxu0 }
 0x8f8   :  { %1273 = vst [vmem:[#allocation8 + $0x78] sm:$0xff] %v1111_v36 }
 0x8f9   :  { %v1115_v18 = vpop.f32.mrf.mxu0 }
 0x8fa   :  { %1727 = vmatmul.mubr.msk.f32.gmra.mxu1 %vm904_vm3, %v2196_v38  ;;  %1719 = vmatmul.mubr.msk.f32.gmra.mxu0 %vm904_vm3, %v2156_v21  ;;  %1274 = vst [vmem:[#allocation8 + $0x80] sm:$0xff] %v1115_v18 }
 0x8fb   :  { %1464 = vmatprep.mubr.f32.mxu1 %v1860_v0  ;;  %1416 = vmatprep.mubr.f32.mxu0 %v1860_v0  ;;  %v1117_v19 = vpop.f32.mrf.mxu0 }
 0x8fc   :  { %1275 = vst [vmem:[#allocation8 + $0x88] sm:$0xff] %v1117_v19 }
 0x8fd   :  { %v1121_v20 = vpop.f32.mrf.mxu0 }
 0x8fe   :  { %1728 = vmatmul.mubr.msk.f32.gmra.mxu1 %vm904_vm3, %v2201_v39  ;;  %1720 = vmatmul.mubr.msk.f32.gmra.mxu0 %vm904_vm3, %v2161_v27  ;;  %1276 = vst [vmem:[#allocation8 + $0x90] sm:$0xff] %v1121_v20 }
 0x8ff   :  { %1470 = vmatprep.mubr.f32.mxu1 %v1860_v0  ;;  %1422 = vmatprep.mubr.f32.mxu0 %v1860_v0  ;;  %v1123_v22 = vpop.f32.mrf.mxu0 }
 0x900   :  { %1277 = vst [vmem:[#allocation8 + $0x98] sm:$0xff] %v1123_v22 }
 0x901   :  { %v1127_v23 = vpop.f32.mrf.mxu0 }
 0x902   :  { %1729 = vmatmul.mubr.msk.f32.gmra.mxu1 %vm904_vm3, %v2206_v15  ;;  %1721 = vmatmul.mubr.msk.f32.gmra.mxu0 %vm904_vm3, %v2166_v47  ;;  %1278 = vst [vmem:[#allocation8 + $0xa0] sm:$0xff] %v1127_v23 }
 0x903   :  { %1476 = vmatprep.mubr.f32.mxu1 %v1860_v0  ;;  %1428 = vmatprep.mubr.f32.mxu0 %v1860_v0  ;;  %v1129_v29 = vpop.f32.mrf.mxu0 }
 0x904   :  { %1279 = vst [vmem:[#allocation8 + $0xa8] sm:$0xff] %v1129_v29 }
 0x905   :  { %v1133_v30 = vpop.f32.mrf.mxu0 }
 0x906   :  { %1730 = vmatmul.mubr.msk.f32.gmra.mxu1 %vm904_vm3, %v2211_v16  ;;  %1722 = vmatmul.mubr.msk.f32.gmra.mxu0 %vm904_vm3, %v2171_v28  ;;  %1280 = vst [vmem:[#allocation8 + $0xb0] sm:$0xff] %v1133_v30 }
 0x907   :  { %1482 = vmatprep.mubr.f32.mxu1 %v1860_v0  ;;  %v1135_v24 = vpop.f32.mrf.mxu0 }
 0x908   :  { %1281 = vst [vmem:[#allocation8 + $0xb8] sm:$0xff] %v1135_v24 }
 0x909   :  { %v1139_v25 = vpop.f32.mrf.mxu0 }
 0x90a   :  { %1731 = vmatmul.mubr.msk.f32.gmra.mxu1 %vm904_vm3, %v2216_v40  ;;  %1282 = vst [vmem:[#allocation8 + $0xc0] sm:$0xff] %v1139_v25 }
 0x90b   :  { %1488 = vmatprep.mubr.f32.mxu1 %v1860_v0  ;;  %v1141_v44 = vpop.f32.mrf.mxu0 }
 0x90c   :  { %1283 = vst [vmem:[#allocation8 + $0xc8] sm:$0xff] %v1141_v44 }
 0x90d   :  { %v1145_v26 = vpop.f32.mrf.mxu0 }
 0x90e   :  { %1732 = vmatmul.mubr.msk.f32.gmra.mxu1 %vm904_vm3, %v2221_v41  ;;  %1284 = vst [vmem:[#allocation8 + $0xd0] sm:$0xff] %v1145_v26 }
 0x90f   :  { %1494 = vmatprep.mubr.f32.mxu1 %v1860_v0  ;;  %v1147_v45 = vpop.f32.mrf.mxu0 }
 0x910   :  { %1285 = vst [vmem:[#allocation8 + $0xd8] sm:$0xff] %v1147_v45 }
 0x911   :  { %v1151_v10 = vpop.f32.mrf.mxu0 }
 0x912   :  { %1733 = vmatmul.mubr.msk.f32.gmra.mxu1 %vm904_vm3, %v2226_v46  ;;  %1286 = vst [vmem:[#allocation8 + $0xe0] sm:$0xff] %v1151_v10 }
 0x913   :  { %1500 = vmatprep.mubr.f32.mxu1 %v1860_v0  ;;  %v1153_v11 = vpop.f32.mrf.mxu0 }
 0x914   :  { %1287 = vst [vmem:[#allocation8 + $0xe8] sm:$0xff] %v1153_v11 }
 0x915   :  { %v1157_v35 = vpop.f32.mrf.mxu0 }
 0x916   :  { %1734 = vmatmul.mubr.msk.f32.gmra.mxu1 %vm904_vm3, %v2231_v50  ;;  %1288 = vst [vmem:[#allocation8 + $0xf0] sm:$0xff] %v1157_v35 }
 0x917   :  { %1506 = vmatprep.mubr.f32.mxu1 %v1860_v0  ;;  %v1159_v21 = vpop.f32.mrf.mxu0 }
 0x918   :  { %1289 = vst [vmem:[#allocation8 + $0xf8] sm:$0xff] %v1159_v21 }
 0x919   :  { %v1163_v27 = vpop.f32.mrf.mxu0 }
 0x91a   :  { %1735 = vmatmul.mubr.msk.f32.gmra.mxu1 %vm904_vm3, %v2236_v52  ;;  %1290 = vst [vmem:[#allocation8 + $0x100] sm:$0xff] %v1163_v27 }
 0x91b   :  { %1512 = vmatprep.mubr.f32.mxu1 %v1860_v0  ;;  %v1165_v47 = vpop.f32.mrf.mxu0 }
 0x91c   :  { %1291 = vst [vmem:[#allocation8 + $0x108] sm:$0xff] %v1165_v47 }
 0x91d   :  { %v1169_v28 = vpop.f32.mrf.mxu0 }
 0x91e   :  { %1736 = vmatmul.mubr.msk.f32.gmra.mxu1 %vm904_vm3, %v2241_v53  ;;  %1292 = vst [vmem:[#allocation8 + $0x110] sm:$0xff] %v1169_v28 }
 0x91f   :  { %1518 = vmatprep.mubr.f32.mxu1 %v1860_v0  ;;  %v1171_v48 = vpop.f32.mrf.mxu0 }
 0x920   :  { %1293 = vst [vmem:[#allocation8 + $0x118] sm:$0xff] %v1171_v48 }
 0x921   :  { %v1175_v31 = vpop.f32.mrf.mxu0 }
 0x922   :  { %1737 = vmatmul.mubr.msk.f32.gmra.mxu1 %vm904_vm3, %v2246_v54  ;;  %1294 = vst [vmem:[#allocation8 + $0x120] sm:$0xff] %v1175_v31 }
 0x923   :  { %1524 = vmatprep.mubr.f32.mxu1 %v1860_v0  ;;  %v1177_v34 = vpop.f32.mrf.mxu0 }
 0x924   :  { %1295 = vst [vmem:[#allocation8 + $0x128] sm:$0xff] %v1177_v34 }
 0x925   :  { %v1181_v37 = vpop.f32.mrf.mxu0 }
 0x926   :  { %1738 = vmatmul.mubr.msk.f32.gmra.mxu1 %vm904_vm3, %v2251_v55  ;;  %1296 = vst [vmem:[#allocation8 + $0x130] sm:$0xff] %v1181_v37 }
 0x927   :  { %1530 = vmatprep.mubr.f32.mxu1 %v1860_v0  ;;  %v1183_v38 = vpop.f32.mrf.mxu0 }
 0x928   :  { %1297 = vst [vmem:[#allocation8 + $0x138] sm:$0xff] %v1183_v38 }
 0x929   :  { %v1187_v39 = vpop.f32.mrf.mxu0 }
 0x92a   :  { %1739 = vmatmul.mubr.msk.f32.gmra.mxu1 %vm904_vm3, %v2256_v56  ;;  %1298 = vst [vmem:[#allocation8 + $0x140] sm:$0xff] %v1187_v39 }
 0x92b   :  { %1536 = vmatprep.mubr.f32.mxu1 %v1860_v0  ;;  %v1189_v15 = vpop.f32.mrf.mxu0 }
 0x92c   :  { %1299 = vst [vmem:[#allocation8 + $0x148] sm:$0xff] %v1189_v15 }
 0x92d   :  { %v1193_v16 = vpop.f32.mrf.mxu0 }
 0x92e   :  { %1740 = vmatmul.mubr.msk.f32.gmra.mxu1 %vm904_vm3, %v2261_v57  ;;  %1300 = vst [vmem:[#allocation8 + $0x150] sm:$0xff] %v1193_v16 }
 0x92f   :  { %1542 = vmatprep.mubr.f32.mxu1 %v1860_v0  ;;  %v1195_v40 = vpop.f32.mrf.mxu0 }
 0x930   :  { %1301 = vst [vmem:[#allocation8 + $0x158] sm:$0xff] %v1195_v40 }
 0x931   :  { %v1199_v41 = vpop.f32.mrf.mxu0 }
 0x932   :  { %1741 = vmatmul.mubr.msk.f32.gmra.mxu1 %vm904_vm3, %v2266_v58  ;;  %1302 = vst [vmem:[#allocation8 + $0x160] sm:$0xff] %v1199_v41 }
 0x933   :  { %1548 = vmatprep.mubr.f32.mxu1 %v1860_v0  ;;  %v1201_v46 = vpop.f32.mrf.mxu0 }
 0x934   :  { %1303 = vst [vmem:[#allocation8 + $0x168] sm:$0xff] %v1201_v46 }
 0x935   :  { %v1205_v50 = vpop.f32.mrf.mxu0 }
 0x936   :  { %1742 = vmatmul.mubr.msk.f32.gmra.mxu1 %vm904_vm3, %v2271_v59  ;;  %1304 = vst [vmem:[#allocation8 + $0x170] sm:$0xff] %v1205_v50 }
 0x937   :  { %1554 = vmatprep.mubr.f32.mxu1 %v1860_v0  ;;  %v1207_v52 = vpop.f32.mrf.mxu0 }
 0x938   :  { %1305 = vst [vmem:[#allocation8 + $0x178] sm:$0xff] %v1207_v52 }
 0x939   :  { %v1211_v53 = vpop.f32.mrf.mxu0 }
 0x93a   :  { %1743 = vmatmul.mubr.msk.f32.gmra.mxu1 %vm904_vm3, %v2276_v60  ;;  %1306 = vst [vmem:[#allocation8 + $0x180] sm:$0xff] %v1211_v53 }
 0x93b   :  { %1560 = vmatprep.mubr.f32.mxu1 %v1860_v0  ;;  %v1213_v54 = vpop.f32.mrf.mxu0 }
 0x93c   :  { %1307 = vst [vmem:[#allocation8 + $0x188] sm:$0xff] %v1213_v54 }
 0x93d   :  { %v1217_v55 = vpop.f32.mrf.mxu0 }
 0x93e   :  { %1744 = vmatmul.mubr.msk.f32.gmra.mxu1 %vm904_vm3, %v2281_v61  ;;  %1308 = vst [vmem:[#allocation8 + $0x190] sm:$0xff] %v1217_v55 }
 0x93f   :  { %1566 = vmatprep.mubr.f32.mxu1 %v1860_v0  ;;  %v1219_v56 = vpop.f32.mrf.mxu0 }
 0x940   :  { %1309 = vst [vmem:[#allocation8 + $0x198] sm:$0xff] %v1219_v56 }
 0x941   :  { %v1223_v57 = vpop.f32.mrf.mxu0 }
 0x942   :  { %1745 = vmatmul.mubr.msk.f32.gmra.mxu1 %vm904_vm3, %v2286_v62  ;;  %1310 = vst [vmem:[#allocation8 + $0x1a0] sm:$0xff] %v1223_v57 }
 0x943   :  { %1572 = vmatprep.mubr.f32.mxu1 %v1860_v0  ;;  %v1225_v58 = vpop.f32.mrf.mxu0 }
 0x944   :  { %1311 = vst [vmem:[#allocation8 + $0x1a8] sm:$0xff] %v1225_v58 }
 0x945   :  { %v1229_v0 = vpop.f32.mrf.mxu0 }
 0x946   :  { %1746 = vmatmul.mubr.msk.f32.gmra.mxu1 %vm904_vm3, %v2291_v63  ;;  %1312 = vst [vmem:[#allocation8 + $0x1b0] sm:$0xff] %v1229_v0 }
 0x947   :  { %v1231_v59 = vpop.f32.mrf.mxu0 }
 0x948   :  { %1313 = vst [vmem:[#allocation8 + $0x1b8] sm:$0xff] %v1231_v59 }
 0x949   :  { %v1235_v60 = vpop.f32.mrf.mxu0 }
 0x94a   :  { %1314 = vst [vmem:[#allocation8 + $0x1c0] sm:$0xff] %v1235_v60 }
 0x94b   :  { %v1237_v61 = vpop.f32.mrf.mxu0 }
 0x94c   :  { %1315 = vst [vmem:[#allocation8 + $0x1c8] sm:$0xff] %v1237_v61 }
 0x94d   :  { %v1241_v62 = vpop.f32.mrf.mxu0 }
 0x94e   :  { %1316 = vst [vmem:[#allocation8 + $0x1d0] sm:$0xff] %v1241_v62 }
 0x94f   :  { %v1243_v63 = vpop.f32.mrf.mxu0 }
 0x950   :  { %1317 = vst [vmem:[#allocation8 + $0x1d8] sm:$0xff] %v1243_v63 }
 0x951   :  { %v1247_v32 = vpop.f32.mrf.mxu0 }
 0x952   :  { %1318 = vst [vmem:[#allocation8 + $0x1e0] sm:$0xff] %v1247_v32 }
 0x953   :  { %v1249_v1 = vpop.f32.mrf.mxu0 }
 0x954   :  { %1319 = vst [vmem:[#allocation8 + $0x1e8] sm:$0xff] %v1249_v1 }
 0x955   :  { %v1253_v33 = vpop.f32.mrf.mxu0 }
 0x956   :  { %1320 = vst [vmem:[#allocation8 + $0x1f0] sm:$0xff] %v1253_v33 }
 0x957   :  { %v1255_v2 = vpop.f32.mrf.mxu0 }
 0x958   :  { %1321 = vst [vmem:[#allocation8 + $0x1f8] sm:$0xff] %v1255_v2 }
 0x9aa   :  { %v1436_v3 = vpop.f32.mrf.mxu1  ;;  %v1388_v4 = vpop.f32.mrf.mxu0 }
 0x9ab   :  { %1596 = vst [vmem:[#allocation8 + $0x280] sm:$0xff] %v1436_v3  ;;  %1580 = vst [vmem:[#allocation8 + $0x200] sm:$0xff] %v1388_v4 }
 0x9ac   :  { %v1438_v5 = vpop.f32.mrf.mxu1  ;;  %v1390_v6 = vpop.f32.mrf.mxu0 }
 0x9ad   :  { %1597 = vst [vmem:[#allocation8 + $0x288] sm:$0xff] %v1438_v5  ;;  %1581 = vst [vmem:[#allocation8 + $0x208] sm:$0xff] %v1390_v6 }
 0x9ae   :  { %v1442_v42 = vpop.f32.mrf.mxu1  ;;  %v1394_v7 = vpop.f32.mrf.mxu0 }
 0x9af   :  { %1598 = vst [vmem:[#allocation8 + $0x290] sm:$0xff] %v1442_v42  ;;  %1582 = vst [vmem:[#allocation8 + $0x210] sm:$0xff] %v1394_v7 }
 0x9b0   :  { %v1444_v43 = vpop.f32.mrf.mxu1  ;;  %v1396_v8 = vpop.f32.mrf.mxu0 }
 0x9b1   :  { %1599 = vst [vmem:[#allocation8 + $0x298] sm:$0xff] %v1444_v43  ;;  %1583 = vst [vmem:[#allocation8 + $0x218] sm:$0xff] %v1396_v8 }
 0x9b2   :  { %v1448_v49 = vpop.f32.mrf.mxu1  ;;  %v1400_v9 = vpop.f32.mrf.mxu0 }
 0x9b3   :  { %1600 = vst [vmem:[#allocation8 + $0x2a0] sm:$0xff] %v1448_v49  ;;  %1584 = vst [vmem:[#allocation8 + $0x220] sm:$0xff] %v1400_v9 }
 0x9b4   :  { %v1450_v51 = vpop.f32.mrf.mxu1  ;;  %v1402_v12 = vpop.f32.mrf.mxu0 }
 0x9b5   :  { %1601 = vst [vmem:[#allocation8 + $0x2a8] sm:$0xff] %v1450_v51  ;;  %1585 = vst [vmem:[#allocation8 + $0x228] sm:$0xff] %v1402_v12 }
 0x9b6   :  { %v1454_v13 = vpop.f32.mrf.mxu1  ;;  %v1406_v14 = vpop.f32.mrf.mxu0 }
 0x9b7   :  { %1602 = vst [vmem:[#allocation8 + $0x2b0] sm:$0xff] %v1454_v13  ;;  %1586 = vst [vmem:[#allocation8 + $0x230] sm:$0xff] %v1406_v14 }
 0x9b8   :  { %v1456_v17 = vpop.f32.mrf.mxu1  ;;  %v1408_v36 = vpop.f32.mrf.mxu0 }
 0x9b9   :  { %1603 = vst [vmem:[#allocation8 + $0x2b8] sm:$0xff] %v1456_v17  ;;  %1587 = vst [vmem:[#allocation8 + $0x238] sm:$0xff] %v1408_v36 }
 0x9ba   :  { %v1460_v18 = vpop.f32.mrf.mxu1  ;;  %v1412_v19 = vpop.f32.mrf.mxu0 }
 0x9bb   :  { %1604 = vst [vmem:[#allocation8 + $0x2c0] sm:$0xff] %v1460_v18  ;;  %1588 = vst [vmem:[#allocation8 + $0x240] sm:$0xff] %v1412_v19 }
 0x9bc   :  { %v1462_v20 = vpop.f32.mrf.mxu1  ;;  %v1414_v22 = vpop.f32.mrf.mxu0 }
 0x9bd   :  { %1605 = vst [vmem:[#allocation8 + $0x2c8] sm:$0xff] %v1462_v20  ;;  %1589 = vst [vmem:[#allocation8 + $0x248] sm:$0xff] %v1414_v22 }
 0x9be   :  { %v1466_v23 = vpop.f32.mrf.mxu1  ;;  %v1418_v29 = vpop.f32.mrf.mxu0 }
 0x9bf   :  { %1606 = vst [vmem:[#allocation8 + $0x2d0] sm:$0xff] %v1466_v23  ;;  %1590 = vst [vmem:[#allocation8 + $0x250] sm:$0xff] %v1418_v29 }
 0x9c0   :  { %v1468_v30 = vpop.f32.mrf.mxu1  ;;  %v1420_v24 = vpop.f32.mrf.mxu0 }
 0x9c1   :  { %1607 = vst [vmem:[#allocation8 + $0x2d8] sm:$0xff] %v1468_v30  ;;  %1591 = vst [vmem:[#allocation8 + $0x258] sm:$0xff] %v1420_v24 }
 0x9c2   :  { %v1472_v25 = vpop.f32.mrf.mxu1  ;;  %v1424_v44 = vpop.f32.mrf.mxu0 }
 0x9c3   :  { %1608 = vst [vmem:[#allocation8 + $0x2e0] sm:$0xff] %v1472_v25  ;;  %1592 = vst [vmem:[#allocation8 + $0x260] sm:$0xff] %v1424_v44 }
 0x9c4   :  { %v1474_v26 = vpop.f32.mrf.mxu1  ;;  %v1426_v45 = vpop.f32.mrf.mxu0 }
 0x9c5   :  { %1609 = vst [vmem:[#allocation8 + $0x2e8] sm:$0xff] %v1474_v26  ;;  %1593 = vst [vmem:[#allocation8 + $0x268] sm:$0xff] %v1426_v45 }
 0x9c6   :  { %v1478_v10 = vpop.f32.mrf.mxu1  ;;  %v1430_v11 = vpop.f32.mrf.mxu0 }
 0x9c7   :  { %1610 = vst [vmem:[#allocation8 + $0x2f0] sm:$0xff] %v1478_v10  ;;  %1594 = vst [vmem:[#allocation8 + $0x270] sm:$0xff] %v1430_v11 }
 0x9c8   :  { %v1480_v35 = vpop.f32.mrf.mxu1  ;;  %v1432_v21 = vpop.f32.mrf.mxu0 }
 0x9c9   :  { %1611 = vst [vmem:[#allocation8 + $0x2f8] sm:$0xff] %v1480_v35  ;;  %1595 = vst [vmem:[#allocation8 + $0x278] sm:$0xff] %v1432_v21 }
 0x9ca   :  { %v1484_v27 = vpop.f32.mrf.mxu1 }
 0x9cb   :  { %1612 = vst [vmem:[#allocation8 + $0x300] sm:$0xff] %v1484_v27 }
 0x9cc   :  { %v1486_v47 = vpop.f32.mrf.mxu1 }
 0x9cd   :  { %1613 = vst [vmem:[#allocation8 + $0x308] sm:$0xff] %v1486_v47 }
 0x9ce   :  { %v1490_v28 = vpop.f32.mrf.mxu1 }
 0x9cf   :  { %1614 = vst [vmem:[#allocation8 + $0x310] sm:$0xff] %v1490_v28 }
 0x9d0   :  { %v1492_v48 = vpop.f32.mrf.mxu1 }
 0x9d1   :  { %1615 = vst [vmem:[#allocation8 + $0x318] sm:$0xff] %v1492_v48 }
 0x9d2   :  { %v1496_v31 = vpop.f32.mrf.mxu1 }
 0x9d3   :  { %1616 = vst [vmem:[#allocation8 + $0x320] sm:$0xff] %v1496_v31 }
 0x9d4   :  { %v1498_v34 = vpop.f32.mrf.mxu1 }
 0x9d5   :  { %1617 = vst [vmem:[#allocation8 + $0x328] sm:$0xff] %v1498_v34 }
 0x9d6   :  { %v1502_v37 = vpop.f32.mrf.mxu1 }
 0x9d7   :  { %1618 = vst [vmem:[#allocation8 + $0x330] sm:$0xff] %v1502_v37 }
 0x9d8   :  { %v1504_v38 = vpop.f32.mrf.mxu1 }
 0x9d9   :  { %1619 = vst [vmem:[#allocation8 + $0x338] sm:$0xff] %v1504_v38 }
 0x9da   :  { %v1508_v39 = vpop.f32.mrf.mxu1 }
 0x9db   :  { %1620 = vst [vmem:[#allocation8 + $0x340] sm:$0xff] %v1508_v39 }
 0x9dc   :  { %v1510_v15 = vpop.f32.mrf.mxu1 }
 0x9dd   :  { %1621 = vst [vmem:[#allocation8 + $0x348] sm:$0xff] %v1510_v15 }
 0x9de   :  { %v1514_v16 = vpop.f32.mrf.mxu1 }
 0x9df   :  { %1622 = vst [vmem:[#allocation8 + $0x350] sm:$0xff] %v1514_v16 }
 0x9e0   :  { %v1516_v40 = vpop.f32.mrf.mxu1 }
 0x9e1   :  { %1623 = vst [vmem:[#allocation8 + $0x358] sm:$0xff] %v1516_v40 }
 0x9e2   :  { %v1520_v41 = vpop.f32.mrf.mxu1 }
 0x9e3   :  { %1624 = vst [vmem:[#allocation8 + $0x360] sm:$0xff] %v1520_v41 }
 0x9e4   :  { %v1522_v46 = vpop.f32.mrf.mxu1 }
 0x9e5   :  { %1625 = vst [vmem:[#allocation8 + $0x368] sm:$0xff] %v1522_v46 }
 0x9e6   :  { %v1526_v50 = vpop.f32.mrf.mxu1 }
 0x9e7   :  { %1626 = vst [vmem:[#allocation8 + $0x370] sm:$0xff] %v1526_v50 }
 0x9e8   :  { %v1528_v52 = vpop.f32.mrf.mxu1 }
 0x9e9   :  { %1627 = vst [vmem:[#allocation8 + $0x378] sm:$0xff] %v1528_v52 }
 0x9ea   :  { %v1532_v53 = vpop.f32.mrf.mxu1 }
 0x9eb   :  { %1628 = vst [vmem:[#allocation8 + $0x380] sm:$0xff] %v1532_v53 }
 0x9ec   :  { %v1534_v54 = vpop.f32.mrf.mxu1 }
 0x9ed   :  { %1629 = vst [vmem:[#allocation8 + $0x388] sm:$0xff] %v1534_v54 }
 0x9ee   :  { %v1538_v55 = vpop.f32.mrf.mxu1 }
 0x9ef   :  { %1630 = vst [vmem:[#allocation8 + $0x390] sm:$0xff] %v1538_v55 }
 0x9f0   :  { %v1540_v56 = vpop.f32.mrf.mxu1 }
 0x9f1   :  { %1631 = vst [vmem:[#allocation8 + $0x398] sm:$0xff] %v1540_v56 }
 0x9f2   :  { %v1544_v57 = vpop.f32.mrf.mxu1 }
 0x9f3   :  { %1632 = vst [vmem:[#allocation8 + $0x3a0] sm:$0xff] %v1544_v57 }
 0x9f4   :  { %v1546_v58 = vpop.f32.mrf.mxu1 }
 0x9f5   :  { %1633 = vst [vmem:[#allocation8 + $0x3a8] sm:$0xff] %v1546_v58 }
 0x9f6   :  { %v1550_v0 = vpop.f32.mrf.mxu1 }
 0x9f7   :  { %1634 = vst [vmem:[#allocation8 + $0x3b0] sm:$0xff] %v1550_v0 }
 0x9f8   :  { %v1552_v59 = vpop.f32.mrf.mxu1 }
 0x9f9   :  { %1635 = vst [vmem:[#allocation8 + $0x3b8] sm:$0xff] %v1552_v59 }
 0x9fa   :  { %v1556_v60 = vpop.f32.mrf.mxu1 }
 0x9fb   :  { %1636 = vst [vmem:[#allocation8 + $0x3c0] sm:$0xff] %v1556_v60 }
 0x9fc   :  { %v1558_v61 = vpop.f32.mrf.mxu1 }
 0x9fd   :  { %1637 = vst [vmem:[#allocation8 + $0x3c8] sm:$0xff] %v1558_v61 }
 0x9fe   :  { %v1562_v62 = vpop.f32.mrf.mxu1 }
 0x9ff   :  { %1638 = vst [vmem:[#allocation8 + $0x3d0] sm:$0xff] %v1562_v62 }
 0xa00   :  { %v1564_v63 = vpop.f32.mrf.mxu1 }
 0xa01   :  { %1639 = vst [vmem:[#allocation8 + $0x3d8] sm:$0xff] %v1564_v63 }
 0xa02   :  { %v1568_v32 = vpop.f32.mrf.mxu1 }
 0xa03   :  { %1640 = vst [vmem:[#allocation8 + $0x3e0] sm:$0xff] %v1568_v32 }
 0xa04   :  { %v1570_v1 = vpop.f32.mrf.mxu1 }
 0xa05   :  { %1641 = vst [vmem:[#allocation8 + $0x3e8] sm:$0xff] %v1570_v1 }
 0xa06   :  { %v1574_v33 = vpop.f32.mrf.mxu1 }
 0xa07   :  { %1642 = vst [vmem:[#allocation8 + $0x3f0] sm:$0xff] %v1574_v33 }
 0xa08   :  { %v1576_v2 = vpop.f32.mrf.mxu1 }
 0xa09   :  { %1643 = vst [vmem:[#allocation8 + $0x3f8] sm:$0xff] %v1576_v2 }
 0xa0a   :  { %1839 = shalt.err (!%p1836_p0)
}
 0xa0b   :  { %1655 = dma.vmem_to_hbm [thread:$0]  %s1650_s17, 16384, %s2404_s8, [#allocation5], %s1855_s30, %s1855_s30, %s1856_s9  }
 0xa0c   :  { %1852 = dma.done.wait [#allocation5], 16384  }
 0xa0d   :  { %1853 = vsyncadd [#allocation5], 4294950912 }
 0xa0e   :  { %1659 = vsyncpa [#allocation4], 1 }
 0xa0f   :  { %1660 = vsyncpa [#allocation7], 1 }
 0xa10   :  { %1661 = vsyncpa [#allocation5], 1 }

</bundles_post_ra>
